<compile_context>
chip_gen: v7x
topology: tpu7x:2x2x1
jax: 0.10.0
libtpu: 0.0.40
codegen_flags: <defaults>
</compile_context>

<pallas_src>
import functools

import jax
import jax.numpy as jnp
from jax.experimental import pallas as pl
from jax.experimental.pallas import tpu as pltpu


# ----------------------------------------------------------------------------
# Pallas kernel: out^T = act(W^T @ X^T + b)   (lane-dense on the M axis)
# ----------------------------------------------------------------------------
def _matmul_t_bias_act_kernel(w_ref, x_ref, b_ref, o_ref, *, neg_slope):
    # (Cout, TM) = (Cout, K) @ (K, TM); f32 accumulation on the MXU.
    acc = jnp.dot(w_ref[...], x_ref[...], preferred_element_type=jnp.float32)
    acc = acc + b_ref[...]                      # (Cout, TM) + (Cout, 1)
    if neg_slope is not None:                   # LeakyReLU(neg_slope)
        acc = jnp.where(acc >= 0, acc, neg_slope * acc)
    o_ref[...] = acc.astype(o_ref.dtype)


def matmul_t_bias_act(wT, xT, b, neg_slope=None):
    """act(wT @ xT + b[:, None]).  wT: (Nout, K), xT: (K, M) -> (Nout, M) f32.

    M (= N*OH*OW for convs) lands on the 128-lane axis -> dense stores.
    """
    Nout, K = wT.shape
    K2, M = xT.shape
    assert K == K2
    b2 = b.reshape(Nout, 1).astype(jnp.float32)

    # Large lane-dense tiles; keep 2 blocks on the big layers so v7x's second
    # TensorCore gets work, single full block for the tiny tail matmuls.
    if M % 2048 == 0:
        TM = 1024
    elif M % 512 == 0:
        TM = 256
    else:
        TM = M
    grid = (M // TM,)

    kernel = functools.partial(_matmul_t_bias_act_kernel, neg_slope=neg_slope)
    return pl.pallas_call(
        kernel,
        out_shape=jax.ShapeDtypeStruct((Nout, M), jnp.float32),
        grid=grid,
        in_specs=[
            pl.BlockSpec((Nout, K), lambda i: (0, 0)),
            pl.BlockSpec((K, TM), lambda i: (0, i)),
            pl.BlockSpec((Nout, 1), lambda i: (0, 0)),
        ],
        out_specs=pl.BlockSpec((Nout, TM), lambda i: (0, i)),
        compiler_params=pltpu.CompilerParams(dimension_semantics=("parallel",)),
    )(wT, xT, b2)


# ----------------------------------------------------------------------------
# Conv2d = im2col in CNHW layout (JAX glue) + lane-dense Pallas matmul
# ----------------------------------------------------------------------------
def _im2col_cnhw(x_cnhw, KH, KW, stride, pad):
    """x: (Cin, N, H, W) -> patches^T: (KH*KW*Cin, N*OH*OW), K-order (ky,kx,cin)."""
    Cin, N, H, W = x_cnhw.shape
    xp = jnp.pad(x_cnhw, ((0, 0), (0, 0), (pad, pad), (pad, pad)))
    Hp, Wp = H + 2 * pad, W + 2 * pad
    OH = (Hp - KH) // stride + 1
    OW = (Wp - KW) // stride + 1
    cols = []
    for i in range(KH):
        for j in range(KW):
            cols.append(
                xp[:, :, i : i + stride * (OH - 1) + 1 : stride,
                         j : j + stride * (OW - 1) + 1 : stride]
            )  # each (Cin, N, OH, OW)
    patches = jnp.stack(cols, axis=0)           # (KH*KW, Cin, N, OH, OW)
    return patches.reshape(KH * KW * Cin, N * OH * OW)


def conv2d_cnhw(x_cnhw, w_oihw, b, *, stride, pad, neg_slope=None):
    """x: (Cin, N, H, W); w: PyTorch (Cout, Cin, KH, KW) -> (Cout, N, OH, OW)."""
    Cin, N, H, W = x_cnhw.shape
    Cout, Cin2, KH, KW = w_oihw.shape
    assert Cin == Cin2
    OH = (H + 2 * pad - KH) // stride + 1
    OW = (W + 2 * pad - KW) // stride + 1
    M = N * OH * OW
    K = KH * KW * Cin

    # bf16 MXU inputs for the big conv matmuls (f32 accumulation in-kernel);
    # cast before im2col so the XLA layout glue moves half the bytes.
    in_dtype = jnp.bfloat16 if (M % 128 == 0 and K % 16 == 0) else jnp.float32

    xT = _im2col_cnhw(x_cnhw.astype(in_dtype), KH, KW, stride, pad)   # (K, M)
    # (Cout,Cin,KH,KW) -> (Cout,KH,KW,Cin) -> (Cout, K): matches (ky,kx,cin).
    wT = jnp.transpose(w_oihw, (0, 2, 3, 1)).reshape(Cout, K).astype(in_dtype)

    out = matmul_t_bias_act(wT, xT, b, neg_slope=neg_slope)           # (Cout, M)
    return out.reshape(Cout, N, OH, OW)


# ----------------------------------------------------------------------------
# Parameters (deterministic, synthetic)
# ----------------------------------------------------------------------------
def init_params(key, cin=3, ck=8, num_classes=5, scale=0.05):
    ks = iter(jax.random.split(key, 16))

    def conv_p(cout, cin_, ksz=4):
        w = jax.random.normal(next(ks), (cout, cin_, ksz, ksz), jnp.float32) * scale
        b = jax.random.normal(next(ks), (cout,), jnp.float32) * scale
        return w, b

    params = {
        "main": [
            conv_p(ck, cin),
            conv_p(ck * 2, ck),
            conv_p(ck * 4, ck * 2),
            conv_p(ck * 8, ck * 4),
        ],
        "cls_conv": conv_p(32, ck * 8),
        "src_conv": conv_p(1, ck * 8),
    }
    params["cls_fc_w"] = jax.random.normal(next(ks), (num_classes, 32), jnp.float32) * scale
    params["cls_fc_b"] = jax.random.normal(next(ks), (num_classes,), jnp.float32) * scale
    params["src_fc_w"] = jax.random.normal(next(ks), (1, 9), jnp.float32) * scale
    params["src_fc_b"] = jax.random.normal(next(ks), (1,), jnp.float32) * scale
    return params


# ----------------------------------------------------------------------------
# Forward pass (semantics of Critic.forward)
# ----------------------------------------------------------------------------
def critic_forward(params, x_nchw):
    N = x_nchw.shape[0]
    # NCHW (PyTorch) -> channel-major CNHW so the transposed matmul outputs
    # (Cout, N*OH*OW) chain directly layer-to-layer.
    x = jnp.transpose(x_nchw, (1, 0, 2, 3)).astype(jnp.float32)

    # main: 4 x [Conv2d(k=4, s=2, p=1) + LeakyReLU(0.2)]
    for (w, b) in params["main"]:
        x = conv2d_cnhw(x, w, b, stride=2, pad=1, neg_slope=0.2)
    # x: (8*ck, N, 4, 4)

    # Fused head conv: src (Cout=1) + cls (Cout=32) share the same im2col
    # patches -> one Cout=33 matmul, then split by channel.
    sw, sb = params["src_conv"]
    cw, cb = params["cls_conv"]
    w_head = jnp.concatenate([sw, cw], axis=0)      # (33, 8*ck, 4, 4)
    b_head = jnp.concatenate([sb, cb], axis=0)      # (33,)
    h = conv2d_cnhw(x, w_head, b_head, stride=1, pad=1, neg_slope=None)  # (33, N, 3, 3)

    # src head: channel 0 -> Flatten -> Linear(9, 1)
    # (C=1 so the NHW flatten matches PyTorch's NCHW flatten.)
    s = h[0].reshape(N, 9).T                                            # (9, N)
    out_src_T = matmul_t_bias_act(params["src_fc_w"], s, params["src_fc_b"])   # (1, N)

    # cls head: channels 1..33 -> MaxPool2d(2) on a 3x3 map (top-left 2x2
    # window; JAX glue) -> Linear(32, num_classes)
    pooled = jnp.max(h[1:, :, :2, :2], axis=(2, 3))                     # (32, N)
    out_cls_T = matmul_t_bias_act(params["cls_fc_w"], pooled, params["cls_fc_b"])  # (num_classes, N)

    # Transpose back to PyTorch's (N, out) convention; the module's
    # `out_dist.view(...)` is a no-op reshape.
    return out_src_T.T, out_cls_T.T


if __name__ == "__main__":
    key = jax.random.PRNGKey(0)
    pkey, xkey = jax.random.split(key)

    num_channels_in, num_channels_ker, num_classes = 3, 8, 5
    params = init_params(pkey, cin=num_channels_in, ck=num_channels_ker,
                         num_classes=num_classes)

    # 64x64 spatial is implied by Linear(32) / Linear(9) in the module.
    x = jax.random.normal(xkey, (2, num_channels_in, 64, 64), jnp.float32)

    fwd = jax.jit(critic_forward)
    out_src, out_cls = fwd(params, x)
    jax.block_until_ready((out_src, out_cls))

    assert out_src.shape == (2, 1), out_src.shape
    assert out_cls.shape == (2, num_classes), out_cls.shape
    assert out_src.dtype == jnp.float32 and out_cls.dtype == jnp.float32
    print("KERNEL_OK")
</pallas_src>

<mosaic_0001>
module attributes {stable_mosaic.version = 11 : i64} {
  func.func @_matmul_t_bias_act_kernel(%arg0: i32, %arg1: memref<8x48xbf16, #tpu.memory_space<vmem>>, %arg2: memref<48x1024xbf16, #tpu.memory_space<vmem>>, %arg3: memref<8x1xf32, #tpu.memory_space<vmem>>, %arg4: memref<8x1024xf32, #tpu.memory_space<vmem>>) attributes {dimension_semantics = [#tpu.dimension_semantics<parallel>], iteration_bounds = array<i64: 2>, scalar_prefetch = 0 : i64, scratch_operands = 0 : i64, tpu.core_type = #tpu.core_type<tc>, window_params = [{pipeline_mode = #tpu.pipeline_mode<synchronous>, transform_indices = @transform_0, window_bounds = array<i64: 8, 48>}, {transform_indices = @transform_1, window_bounds = array<i64: 48, 1024>}, {pipeline_mode = #tpu.pipeline_mode<synchronous>, transform_indices = @transform_2, window_bounds = array<i64: 8, 1>}, {transform_indices = @transform_3, window_bounds = array<i64: 8, 1024>}]} {
    %c0 = arith.constant 0 : index
    %c0_0 = arith.constant 0 : index
    %0 = vector.load %arg1[%c0, %c0_0] : memref<8x48xbf16, #tpu.memory_space<vmem>>, vector<8x48xbf16>
    %c0_1 = arith.constant 0 : index
    %c0_2 = arith.constant 0 : index
    %1 = vector.load %arg2[%c0_1, %c0_2] : memref<48x1024xbf16, #tpu.memory_space<vmem>>, vector<48x1024xbf16>
    %cst = arith.constant dense<0.000000e+00> : vector<8x1024xf32>
    %2 = tpu.matmul %0, %1, %cst {dimension_numbers = #tpu.dot_dimension_numbers<[1], [0], [0], [1], [0, 0, 1, 1], [], []>} : vector<8x48xbf16>, vector<48x1024xbf16>, vector<8x1024xf32> -> vector<8x1024xf32>
    %c0_3 = arith.constant 0 : index
    %c0_4 = arith.constant 0 : index
    %3 = vector.load %arg3[%c0_3, %c0_4] : memref<8x1xf32, #tpu.memory_space<vmem>>, vector<8x1xf32>
    %4 = vector.broadcast %3 : vector<8x1xf32> to vector<8x1024xf32>
    %5 = arith.addf %2, %4 : vector<8x1024xf32>
    %cst_5 = arith.constant 0.000000e+00 : f32
    %6 = vector.broadcast %cst_5 : f32 to vector<8x1024xf32>
    %7 = arith.cmpf oge, %5, %6 : vector<8x1024xf32>
    %cst_6 = arith.constant 2.000000e-01 : f32
    %8 = vector.broadcast %cst_6 : f32 to vector<8x1024xf32>
    %9 = arith.mulf %8, %5 : vector<8x1024xf32>
    %10 = arith.select %7, %5, %9 : vector<8x1024xi1>, vector<8x1024xf32>
    %c0_7 = arith.constant 0 : index
    %c0_8 = arith.constant 0 : index
    %11 = vector.load %arg4[%c0_7, %c0_8] : memref<8x1024xf32, #tpu.memory_space<vmem>>, vector<8x1024xf32>
    tpu.vector_store %arg4[%c0_7, %c0_8], %10 {strides = array<i32>} : memref<8x1024xf32, #tpu.memory_space<vmem>>, vector<8x1024xf32>,
    return
  }
  func.func @transform_0(%arg0: i32) -> (i32, i32) {
    %c0_i32 = arith.constant 0 : i32
    %c0_i32_0 = arith.constant 0 : i32
    %c0_i32_1 = arith.constant 0 : i32
    return %c0_i32, %c0_i32_0 : i32, i32
  }
  func.func @transform_1(%arg0: i32) -> (i32, i32) {
    %c0_i32 = arith.constant 0 : i32
    %c0_i32_0 = arith.constant 0 : i32
    return %c0_i32, %arg0 : i32, i32
  }
  func.func @transform_2(%arg0: i32) -> (i32, i32) {
    %c0_i32 = arith.constant 0 : i32
    %c0_i32_0 = arith.constant 0 : i32
    %c0_i32_1 = arith.constant 0 : i32
    return %c0_i32, %c0_i32_0 : i32, i32
  }
  func.func @transform_3(%arg0: i32) -> (i32, i32) {
    %c0_i32 = arith.constant 0 : i32
    %c0_i32_0 = arith.constant 0 : i32
    return %c0_i32, %arg0 : i32, i32
  }
}

module attributes {stable_mosaic.version = 11 : i64} {
  func.func @_matmul_t_bias_act_kernel(%arg0: i32, %arg1: memref<16x128xbf16, #tpu.memory_space<vmem>>, %arg2: memref<128x256xbf16, #tpu.memory_space<vmem>>, %arg3: memref<16x1xf32, #tpu.memory_space<vmem>>, %arg4: memref<16x256xf32, #tpu.memory_space<vmem>>) attributes {dimension_semantics = [#tpu.dimension_semantics<parallel>], iteration_bounds = array<i64: 2>, scalar_prefetch = 0 : i64, scratch_operands = 0 : i64, tpu.core_type = #tpu.core_type<tc>, window_params = [{pipeline_mode = #tpu.pipeline_mode<synchronous>, transform_indices = @transform_0, window_bounds = array<i64: 16, 128>}, {transform_indices = @transform_1, window_bounds = array<i64: 128, 256>}, {pipeline_mode = #tpu.pipeline_mode<synchronous>, transform_indices = @transform_2, window_bounds = array<i64: 16, 1>}, {transform_indices = @transform_3, window_bounds = array<i64: 16, 256>}]} {
    %c0 = arith.constant 0 : index
    %c0_0 = arith.constant 0 : index
    %0 = vector.load %arg1[%c0, %c0_0] : memref<16x128xbf16, #tpu.memory_space<vmem>>, vector<16x128xbf16>
    %c0_1 = arith.constant 0 : index
    %c0_2 = arith.constant 0 : index
    %1 = vector.load %arg2[%c0_1, %c0_2] : memref<128x256xbf16, #tpu.memory_space<vmem>>, vector<128x256xbf16>
    %cst = arith.constant dense<0.000000e+00> : vector<16x256xf32>
    %2 = tpu.matmul %0, %1, %cst {dimension_numbers = #tpu.dot_dimension_numbers<[1], [0], [0], [1], [0, 0, 1, 1], [], []>} : vector<16x128xbf16>, vector<128x256xbf16>, vector<16x256xf32> -> vector<16x256xf32>
    %c0_3 = arith.constant 0 : index
    %c0_4 = arith.constant 0 : index
    %3 = vector.load %arg3[%c0_3, %c0_4] : memref<16x1xf32, #tpu.memory_space<vmem>>, vector<16x1xf32>
    %4 = vector.broadcast %3 : vector<16x1xf32> to vector<16x256xf32>
    %5 = arith.addf %2, %4 : vector<16x256xf32>
    %cst_5 = arith.constant 0.000000e+00 : f32
    %6 = vector.broadcast %cst_5 : f32 to vector<16x256xf32>
    %7 = arith.cmpf oge, %5, %6 : vector<16x256xf32>
    %cst_6 = arith.constant 2.000000e-01 : f32
    %8 = vector.broadcast %cst_6 : f32 to vector<16x256xf32>
    %9 = arith.mulf %8, %5 : vector<16x256xf32>
    %10 = arith.select %7, %5, %9 : vector<16x256xi1>, vector<16x256xf32>
    %c0_7 = arith.constant 0 : index
    %c0_8 = arith.constant 0 : index
    %11 = vector.load %arg4[%c0_7, %c0_8] : memref<16x256xf32, #tpu.memory_space<vmem>>, vector<16x256xf32>
    tpu.vector_store %arg4[%c0_7, %c0_8], %10 {strides = array<i32>} : memref<16x256xf32, #tpu.memory_space<vmem>>, vector<16x256xf32>,
    return
  }
  func.func @transform_0(%arg0: i32) -> (i32, i32) {
    %c0_i32 = arith.constant 0 : i32
    %c0_i32_0 = arith.constant 0 : i32
    %c0_i32_1 = arith.constant 0 : i32
    return %c0_i32, %c0_i32_0 : i32, i32
  }
  func.func @transform_1(%arg0: i32) -> (i32, i32) {
    %c0_i32 = arith.constant 0 : i32
    %c0_i32_0 = arith.constant 0 : i32
    return %c0_i32, %arg0 : i32, i32
  }
  func.func @transform_2(%arg0: i32) -> (i32, i32) {
    %c0_i32 = arith.constant 0 : i32
    %c0_i32_0 = arith.constant 0 : i32
    %c0_i32_1 = arith.constant 0 : i32
    return %c0_i32, %c0_i32_0 : i32, i32
  }
  func.func @transform_3(%arg0: i32) -> (i32, i32) {
    %c0_i32 = arith.constant 0 : i32
    %c0_i32_0 = arith.constant 0 : i32
    return %c0_i32, %arg0 : i32, i32
  }
}

module attributes {stable_mosaic.version = 11 : i64} {
  func.func @_matmul_t_bias_act_kernel(%arg0: i32, %arg1: memref<32x256xbf16, #tpu.memory_space<vmem>>, %arg2: memref<256x128xbf16, #tpu.memory_space<vmem>>, %arg3: memref<32x1xf32, #tpu.memory_space<vmem>>, %arg4: memref<32x128xf32, #tpu.memory_space<vmem>>) attributes {dimension_semantics = [#tpu.dimension_semantics<parallel>], iteration_bounds = array<i64: 1>, scalar_prefetch = 0 : i64, scratch_operands = 0 : i64, tpu.core_type = #tpu.core_type<tc>, window_params = [{pipeline_mode = #tpu.pipeline_mode<synchronous>, transform_indices = @transform_0, window_bounds = array<i64: 32, 256>}, {transform_indices = @transform_1, window_bounds = array<i64: 256, 128>}, {pipeline_mode = #tpu.pipeline_mode<synchronous>, transform_indices = @transform_2, window_bounds = array<i64: 32, 1>}, {transform_indices = @transform_3, window_bounds = array<i64: 32, 128>}]} {
    %c0 = arith.constant 0 : index
    %c0_0 = arith.constant 0 : index
    %0 = vector.load %arg1[%c0, %c0_0] : memref<32x256xbf16, #tpu.memory_space<vmem>>, vector<32x256xbf16>
    %c0_1 = arith.constant 0 : index
    %c0_2 = arith.constant 0 : index
    %1 = vector.load %arg2[%c0_1, %c0_2] : memref<256x128xbf16, #tpu.memory_space<vmem>>, vector<256x128xbf16>
    %cst = arith.constant dense<0.000000e+00> : vector<32x128xf32>
    %2 = tpu.matmul %0, %1, %cst {dimension_numbers = #tpu.dot_dimension_numbers<[1], [0], [0], [1], [0, 0, 1, 1], [], []>} : vector<32x256xbf16>, vector<256x128xbf16>, vector<32x128xf32> -> vector<32x128xf32>
    %c0_3 = arith.constant 0 : index
    %c0_4 = arith.constant 0 : index
    %3 = vector.load %arg3[%c0_3, %c0_4] : memref<32x1xf32, #tpu.memory_space<vmem>>, vector<32x1xf32>
    %4 = vector.broadcast %3 : vector<32x1xf32> to vector<32x128xf32>
    %5 = arith.addf %2, %4 : vector<32x128xf32>
    %cst_5 = arith.constant 0.000000e+00 : f32
    %6 = vector.broadcast %cst_5 : f32 to vector<32x128xf32>
    %7 = arith.cmpf oge, %5, %6 : vector<32x128xf32>
    %cst_6 = arith.constant 2.000000e-01 : f32
    %8 = vector.broadcast %cst_6 : f32 to vector<32x128xf32>
    %9 = arith.mulf %8, %5 : vector<32x128xf32>
    %10 = arith.select %7, %5, %9 : vector<32x128xi1>, vector<32x128xf32>
    %c0_7 = arith.constant 0 : index
    %c0_8 = arith.constant 0 : index
    %11 = vector.load %arg4[%c0_7, %c0_8] : memref<32x128xf32, #tpu.memory_space<vmem>>, vector<32x128xf32>
    tpu.vector_store %arg4[%c0_7, %c0_8], %10 {strides = array<i32>} : memref<32x128xf32, #tpu.memory_space<vmem>>, vector<32x128xf32>,
    return
  }
  func.func @transform_0(%arg0: i32) -> (i32, i32) {
    %c0_i32 = arith.constant 0 : i32
    %c0_i32_0 = arith.constant 0 : i32
    %c0_i32_1 = arith.constant 0 : i32
    return %c0_i32, %c0_i32_0 : i32, i32
  }
  func.func @transform_1(%arg0: i32) -> (i32, i32) {
    %c0_i32 = arith.constant 0 : i32
    %c0_i32_0 = arith.constant 0 : i32
    return %c0_i32, %arg0 : i32, i32
  }
  func.func @transform_2(%arg0: i32) -> (i32, i32) {
    %c0_i32 = arith.constant 0 : i32
    %c0_i32_0 = arith.constant 0 : i32
    %c0_i32_1 = arith.constant 0 : i32
    return %c0_i32, %c0_i32_0 : i32, i32
  }
  func.func @transform_3(%arg0: i32) -> (i32, i32) {
    %c0_i32 = arith.constant 0 : i32
    %c0_i32_0 = arith.constant 0 : i32
    return %c0_i32, %arg0 : i32, i32
  }
}

module attributes {stable_mosaic.version = 11 : i64} {
  func.func @_matmul_t_bias_act_kernel(%arg0: i32, %arg1: memref<64x512xf32, #tpu.memory_space<vmem>>, %arg2: memref<512x32xf32, #tpu.memory_space<vmem>>, %arg3: memref<64x1xf32, #tpu.memory_space<vmem>>, %arg4: memref<64x32xf32, #tpu.memory_space<vmem>>) attributes {dimension_semantics = [#tpu.dimension_semantics<parallel>], iteration_bounds = array<i64: 1>, scalar_prefetch = 0 : i64, scratch_operands = 0 : i64, tpu.core_type = #tpu.core_type<tc>, window_params = [{pipeline_mode = #tpu.pipeline_mode<synchronous>, transform_indices = @transform_0, window_bounds = array<i64: 64, 512>}, {transform_indices = @transform_1, window_bounds = array<i64: 512, 32>}, {pipeline_mode = #tpu.pipeline_mode<synchronous>, transform_indices = @transform_2, window_bounds = array<i64: 64, 1>}, {transform_indices = @transform_3, window_bounds = array<i64: 64, 32>}]} {
    %c0 = arith.constant 0 : index
    %c0_0 = arith.constant 0 : index
    %0 = vector.load %arg1[%c0, %c0_0] : memref<64x512xf32, #tpu.memory_space<vmem>>, vector<64x512xf32>
    %c0_1 = arith.constant 0 : index
    %c0_2 = arith.constant 0 : index
    %1 = vector.load %arg2[%c0_1, %c0_2] : memref<512x32xf32, #tpu.memory_space<vmem>>, vector<512x32xf32>
    %cst = arith.constant dense<0.000000e+00> : vector<64x32xf32>
    %2 = tpu.matmul %0, %1, %cst {dimension_numbers = #tpu.dot_dimension_numbers<[1], [0], [0], [1], [0, 0, 1, 1], [], []>} : vector<64x512xf32>, vector<512x32xf32>, vector<64x32xf32> -> vector<64x32xf32>
    %c0_3 = arith.constant 0 : index
    %c0_4 = arith.constant 0 : index
    %3 = vector.load %arg3[%c0_3, %c0_4] : memref<64x1xf32, #tpu.memory_space<vmem>>, vector<64x1xf32>
    %4 = vector.broadcast %3 : vector<64x1xf32> to vector<64x32xf32>
    %5 = arith.addf %2, %4 : vector<64x32xf32>
    %cst_5 = arith.constant 0.000000e+00 : f32
    %6 = vector.broadcast %cst_5 : f32 to vector<64x32xf32>
    %7 = arith.cmpf oge, %5, %6 : vector<64x32xf32>
    %cst_6 = arith.constant 2.000000e-01 : f32
    %8 = vector.broadcast %cst_6 : f32 to vector<64x32xf32>
    %9 = arith.mulf %8, %5 : vector<64x32xf32>
    %10 = arith.select %7, %5, %9 : vector<64x32xi1>, vector<64x32xf32>
    %c0_7 = arith.constant 0 : index
    %c0_8 = arith.constant 0 : index
    %11 = vector.load %arg4[%c0_7, %c0_8] : memref<64x32xf32, #tpu.memory_space<vmem>>, vector<64x32xf32>
    tpu.vector_store %arg4[%c0_7, %c0_8], %10 {strides = array<i32>} : memref<64x32xf32, #tpu.memory_space<vmem>>, vector<64x32xf32>,
    return
  }
  func.func @transform_0(%arg0: i32) -> (i32, i32) {
    %c0_i32 = arith.constant 0 : i32
    %c0_i32_0 = arith.constant 0 : i32
    %c0_i32_1 = arith.constant 0 : i32
    return %c0_i32, %c0_i32_0 : i32, i32
  }
  func.func @transform_1(%arg0: i32) -> (i32, i32) {
    %c0_i32 = arith.constant 0 : i32
    %c0_i32_0 = arith.constant 0 : i32
    return %c0_i32, %arg0 : i32, i32
  }
  func.func @transform_2(%arg0: i32) -> (i32, i32) {
    %c0_i32 = arith.constant 0 : i32
    %c0_i32_0 = arith.constant 0 : i32
    %c0_i32_1 = arith.constant 0 : i32
    return %c0_i32, %c0_i32_0 : i32, i32
  }
  func.func @transform_3(%arg0: i32) -> (i32, i32) {
    %c0_i32 = arith.constant 0 : i32
    %c0_i32_0 = arith.constant 0 : i32
    return %c0_i32, %arg0 : i32, i32
  }
}

module attributes {stable_mosaic.version = 11 : i64} {
  func.func @_matmul_t_bias_act_kernel(%arg0: i32, %arg1: memref<33x1024xf32, #tpu.memory_space<vmem>>, %arg2: memref<1024x18xf32, #tpu.memory_space<vmem>>, %arg3: memref<33x1xf32, #tpu.memory_space<vmem>>, %arg4: memref<33x18xf32, #tpu.memory_space<vmem>>) attributes {dimension_semantics = [#tpu.dimension_semantics<parallel>], iteration_bounds = array<i64: 1>, scalar_prefetch = 0 : i64, scratch_operands = 0 : i64, tpu.core_type = #tpu.core_type<tc>, window_params = [{pipeline_mode = #tpu.pipeline_mode<synchronous>, transform_indices = @transform_0, window_bounds = array<i64: 33, 1024>}, {transform_indices = @transform_1, window_bounds = array<i64: 1024, 18>}, {pipeline_mode = #tpu.pipeline_mode<synchronous>, transform_indices = @transform_2, window_bounds = array<i64: 33, 1>}, {transform_indices = @transform_3, window_bounds = array<i64: 33, 18>}]} {
    %c0 = arith.constant 0 : index
    %c0_0 = arith.constant 0 : index
    %0 = vector.load %arg1[%c0, %c0_0] : memref<33x1024xf32, #tpu.memory_space<vmem>>, vector<33x1024xf32>
    %c0_1 = arith.constant 0 : index
    %c0_2 = arith.constant 0 : index
    %1 = vector.load %arg2[%c0_1, %c0_2] : memref<1024x18xf32, #tpu.memory_space<vmem>>, vector<1024x18xf32>
    %cst = arith.constant dense<0.000000e+00> : vector<33x18xf32>
    %2 = tpu.matmul %0, %1, %cst {dimension_numbers = #tpu.dot_dimension_numbers<[1], [0], [0], [1], [0, 0, 1, 1], [], []>} : vector<33x1024xf32>, vector<1024x18xf32>, vector<33x18xf32> -> vector<33x18xf32>
    %c0_3 = arith.constant 0 : index
    %c0_4 = arith.constant 0 : index
    %3 = vector.load %arg3[%c0_3, %c0_4] : memref<33x1xf32, #tpu.memory_space<vmem>>, vector<33x1xf32>
    %4 = vector.broadcast %3 : vector<33x1xf32> to vector<33x18xf32>
    %5 = arith.addf %2, %4 : vector<33x18xf32>
    %c0_5 = arith.constant 0 : index
    %c0_6 = arith.constant 0 : index
    %6 = vector.load %arg4[%c0_5, %c0_6] : memref<33x18xf32, #tpu.memory_space<vmem>>, vector<33x18xf32>
    tpu.vector_store %arg4[%c0_5, %c0_6], %5 {strides = array<i32>} : memref<33x18xf32, #tpu.memory_space<vmem>>, vector<33x18xf32>,
    return
  }
  func.func @transform_0(%arg0: i32) -> (i32, i32) {
    %c0_i32 = arith.constant 0 : i32
    %c0_i32_0 = arith.constant 0 : i32
    %c0_i32_1 = arith.constant 0 : i32
    return %c0_i32, %c0_i32_0 : i32, i32
  }
  func.func @transform_1(%arg0: i32) -> (i32, i32) {
    %c0_i32 = arith.constant 0 : i32
    %c0_i32_0 = arith.constant 0 : i32
    return %c0_i32, %arg0 : i32, i32
  }
  func.func @transform_2(%arg0: i32) -> (i32, i32) {
    %c0_i32 = arith.constant 0 : i32
    %c0_i32_0 = arith.constant 0 : i32
    %c0_i32_1 = arith.constant 0 : i32
    return %c0_i32, %c0_i32_0 : i32, i32
  }
  func.func @transform_3(%arg0: i32) -> (i32, i32) {
    %c0_i32 = arith.constant 0 : i32
    %c0_i32_0 = arith.constant 0 : i32
    return %c0_i32, %arg0 : i32, i32
  }
}

module attributes {stable_mosaic.version = 11 : i64} {
  func.func @_matmul_t_bias_act_kernel(%arg0: i32, %arg1: memref<5x32xf32, #tpu.memory_space<vmem>>, %arg2: memref<32x2xf32, #tpu.memory_space<vmem>>, %arg3: memref<5x1xf32, #tpu.memory_space<vmem>>, %arg4: memref<5x2xf32, #tpu.memory_space<vmem>>) attributes {dimension_semantics = [#tpu.dimension_semantics<parallel>], iteration_bounds = array<i64: 1>, scalar_prefetch = 0 : i64, scratch_operands = 0 : i64, tpu.core_type = #tpu.core_type<tc>, window_params = [{pipeline_mode = #tpu.pipeline_mode<synchronous>, transform_indices = @transform_0, window_bounds = array<i64: 5, 32>}, {transform_indices = @transform_1, window_bounds = array<i64: 32, 2>}, {pipeline_mode = #tpu.pipeline_mode<synchronous>, transform_indices = @transform_2, window_bounds = array<i64: 5, 1>}, {transform_indices = @transform_3, window_bounds = array<i64: 5, 2>}]} {
    %c0 = arith.constant 0 : index
    %c0_0 = arith.constant 0 : index
    %0 = vector.load %arg1[%c0, %c0_0] : memref<5x32xf32, #tpu.memory_space<vmem>>, vector<5x32xf32>
    %c0_1 = arith.constant 0 : index
    %c0_2 = arith.constant 0 : index
    %1 = vector.load %arg2[%c0_1, %c0_2] : memref<32x2xf32, #tpu.memory_space<vmem>>, vector<32x2xf32>
    %cst = arith.constant dense<0.000000e+00> : vector<5x2xf32>
    %2 = tpu.matmul %0, %1, %cst {dimension_numbers = #tpu.dot_dimension_numbers<[1], [0], [0], [1], [0, 0, 1, 1], [], []>} : vector<5x32xf32>, vector<32x2xf32>, vector<5x2xf32> -> vector<5x2xf32>
    %c0_3 = arith.constant 0 : index
    %c0_4 = arith.constant 0 : index
    %3 = vector.load %arg3[%c0_3, %c0_4] : memref<5x1xf32, #tpu.memory_space<vmem>>, vector<5x1xf32>
    %4 = vector.broadcast %3 : vector<5x1xf32> to vector<5x2xf32>
    %5 = arith.addf %2, %4 : vector<5x2xf32>
    %c0_5 = arith.constant 0 : index
    %c0_6 = arith.constant 0 : index
    %6 = vector.load %arg4[%c0_5, %c0_6] : memref<5x2xf32, #tpu.memory_space<vmem>>, vector<5x2xf32>
    tpu.vector_store %arg4[%c0_5, %c0_6], %5 {strides = array<i32>} : memref<5x2xf32, #tpu.memory_space<vmem>>, vector<5x2xf32>,
    return
  }
  func.func @transform_0(%arg0: i32) -> (i32, i32) {
    %c0_i32 = arith.constant 0 : i32
    %c0_i32_0 = arith.constant 0 : i32
    %c0_i32_1 = arith.constant 0 : i32
    return %c0_i32, %c0_i32_0 : i32, i32
  }
  func.func @transform_1(%arg0: i32) -> (i32, i32) {
    %c0_i32 = arith.constant 0 : i32
    %c0_i32_0 = arith.constant 0 : i32
    return %c0_i32, %arg0 : i32, i32
  }
  func.func @transform_2(%arg0: i32) -> (i32, i32) {
    %c0_i32 = arith.constant 0 : i32
    %c0_i32_0 = arith.constant 0 : i32
    %c0_i32_1 = arith.constant 0 : i32
    return %c0_i32, %c0_i32_0 : i32, i32
  }
  func.func @transform_3(%arg0: i32) -> (i32, i32) {
    %c0_i32 = arith.constant 0 : i32
    %c0_i32_0 = arith.constant 0 : i32
    return %c0_i32, %arg0 : i32, i32
  }
}

module attributes {stable_mosaic.version = 11 : i64} {
  func.func @_matmul_t_bias_act_kernel(%arg0: i32, %arg1: memref<1x9xf32, #tpu.memory_space<vmem>>, %arg2: memref<9x2xf32, #tpu.memory_space<vmem>>, %arg3: memref<1x1xf32, #tpu.memory_space<vmem>>, %arg4: memref<1x2xf32, #tpu.memory_space<vmem>>) attributes {dimension_semantics = [#tpu.dimension_semantics<parallel>], iteration_bounds = array<i64: 1>, scalar_prefetch = 0 : i64, scratch_operands = 0 : i64, tpu.core_type = #tpu.core_type<tc>, window_params = [{pipeline_mode = #tpu.pipeline_mode<synchronous>, transform_indices = @transform_0, window_bounds = array<i64: 1, 9>}, {transform_indices = @transform_1, window_bounds = array<i64: 9, 2>}, {pipeline_mode = #tpu.pipeline_mode<synchronous>, transform_indices = @transform_2, window_bounds = array<i64: 1, 1>}, {transform_indices = @transform_3, window_bounds = array<i64: 1, 2>}]} {
    %c0 = arith.constant 0 : index
    %c0_0 = arith.constant 0 : index
    %0 = vector.load %arg1[%c0, %c0_0] : memref<1x9xf32, #tpu.memory_space<vmem>>, vector<1x9xf32>
    %c0_1 = arith.constant 0 : index
    %c0_2 = arith.constant 0 : index
    %1 = vector.load %arg2[%c0_1, %c0_2] : memref<9x2xf32, #tpu.memory_space<vmem>>, vector<9x2xf32>
    %cst = arith.constant dense<0.000000e+00> : vector<1x2xf32>
    %2 = tpu.matmul %0, %1, %cst {dimension_numbers = #tpu.dot_dimension_numbers<[1], [0], [0], [1], [0, 0, 1, 1], [], []>} : vector<1x9xf32>, vector<9x2xf32>, vector<1x2xf32> -> vector<1x2xf32>
    %c0_3 = arith.constant 0 : index
    %c0_4 = arith.constant 0 : index
    %3 = vector.load %arg3[%c0_3, %c0_4] : memref<1x1xf32, #tpu.memory_space<vmem>>, vector<1x1xf32>
    %4 = vector.broadcast %3 : vector<1x1xf32> to vector<1x2xf32>
    %5 = arith.addf %2, %4 : vector<1x2xf32>
    %c0_5 = arith.constant 0 : index
    %c0_6 = arith.constant 0 : index
    %6 = vector.load %arg4[%c0_5, %c0_6] : memref<1x2xf32, #tpu.memory_space<vmem>>, vector<1x2xf32>
    tpu.vector_store %arg4[%c0_5, %c0_6], %5 {strides = array<i32>} : memref<1x2xf32, #tpu.memory_space<vmem>>, vector<1x2xf32>,
    return
  }
  func.func @transform_0(%arg0: i32) -> (i32, i32) {
    %c0_i32 = arith.constant 0 : i32
    %c0_i32_0 = arith.constant 0 : i32
    %c0_i32_1 = arith.constant 0 : i32
    return %c0_i32, %c0_i32_0 : i32, i32
  }
  func.func @transform_1(%arg0: i32) -> (i32, i32) {
    %c0_i32 = arith.constant 0 : i32
    %c0_i32_0 = arith.constant 0 : i32
    return %c0_i32, %arg0 : i32, i32
  }
  func.func @transform_2(%arg0: i32) -> (i32, i32) {
    %c0_i32 = arith.constant 0 : i32
    %c0_i32_0 = arith.constant 0 : i32
    %c0_i32_1 = arith.constant 0 : i32
    return %c0_i32, %c0_i32_0 : i32, i32
  }
  func.func @transform_3(%arg0: i32) -> (i32, i32) {
    %c0_i32 = arith.constant 0 : i32
    %c0_i32_0 = arith.constant 0 : i32
    return %c0_i32, %arg0 : i32, i32
  }
}

</mosaic_0001>

<bundles_post_ra>
// kernel: critic_forward.7
= control target key start
LH: loop header
LB: loop body
LE: loop exit
PB: predicated region body
PF: predicated region fallthrough
CT: control target
= control target key end

     0   :  { %s766_s12 = smov 0   ;;  %s768_s13 = smov 0   ;;  %s921_s0 = inlined_call_operand.vmem [shape: bf16[8,48], index: 0, kind: input, shape index: {}]   ;;  %s922_s1 = inlined_call_operand.vmem [shape: bf16[48,2048], index: 1, kind: input, shape index: {}]   ;;  %s923_s2 = inlined_call_operand.vmem [shape: f32[8,1], index: 2, kind: input, shape index: {}]   ;;  %s924_s3 = inlined_call_operand.vmem [shape: f32[8,2048], index: 3, kind: output, shape index: {}]  }
   0x1   :  { %s770_s14 = smov 0  }
   0x2 LB: > { %s653_s15 = sadd.s32 4294967295, %s743_s14   ;;  %s783_s16 = sadd.s32 1, %s743_s14   ;;  %s743_s14 = sphi %s770_s14, %s927_s14   ;;  %s739_s13 = sphi %s768_s13, %s926_s13   ;;  %s735_s12 = sphi %s766_s12, %s925_s12  }
   0x3   : > { %s38_s17 = ssub.s32 %s743_s14, %s783_s16  ;;  %s41_s18 = sadd.s32 1, %s739_s13 }
   0x4   : > { %p39_p0 = scmp.eq.s32.totalorder %s38_s17, 0  ;;  %p48_p1 = scmp.ne.s32.totalorder %s739_s13, %s735_s12 }
   0x5   : > { %p49_p2 = scmp.eq.s32.totalorder %s743_s14, 0  ;;  %p656_p4 = scmp.ge.s32.totalorder %s743_s14, 2 }
   0x6   : > { %s792_s19 = scalar_select %p39_p0, %s739_s13, %s41_s18  }
   0x7   : > { %p50_p3 = por %p49_p2, %p48_p1  ;;  %127 = sbr.rel (%p656_p4) target bundleno = 31 (0x1f), region = 24 }
   0xe   : > { %130 = sbr.rel (!%p50_p3) target bundleno = 31 (0x1f), region = 28  ;;  %s132_s20 = sand.u32 (%p50_p3), 1, %s739_s13  }
   0xf   : > { %s692_s21 = sshll.u32 (%p50_p3), %s743_s14, 5  ;;  %s693_s22 = smul.u32 (%p50_p3), 192, %s132_s20 }
  0x10   : > { %s800_s25 = scalar_lea.vmem (%p50_p3), %s922_s1, %s692_s21 }
  0x11   : > { %v150_v0 = vld [vmem:[%s800_s25] sm:$0xff] (%p50_p3)  ;;  %v152_v1 = vld [vmem:[%s800_s25 + $0x8] sm:$0xff] (%p50_p3)  ;;  %v154_v2 = vld [vmem:[%s800_s25 + $0x10] sm:$0xff] (%p50_p3)  ;;  %s808_s26 = scalar_lea.vmem (%p50_p3), [#allocation2], %s693_s22 }
  0x12   : > { %v156_v3 = vld [vmem:[%s800_s25 + $0x18] sm:$0xff] (%p50_p3)  ;;  %v158_v4 = vld [vmem:[%s800_s25 + $0x40] sm:$0xff] (%p50_p3)  ;;  %v160_v5 = vld [vmem:[%s800_s25 + $0x48] sm:$0xff] (%p50_p3)  ;;  %151 = vst [vmem:[%s808_s26] sm:$0xff] (%p50_p3), %v150_v0 }
  0x13   : > { %153 = vst [vmem:[%s808_s26 + $0x8] sm:$0xff] (%p50_p3), %v152_v1  ;;  %155 = vst [vmem:[%s808_s26 + $0x10] sm:$0xff] (%p50_p3), %v154_v2  ;;  %v162_v6 = vld [vmem:[%s800_s25 + $0x50] sm:$0xff] (%p50_p3)  ;;  %v164_v7 = vld [vmem:[%s800_s25 + $0x58] sm:$0xff] (%p50_p3) }
  0x14   : > { %157 = vst [vmem:[%s808_s26 + $0x18] sm:$0xff] (%p50_p3), %v156_v3  ;;  %159 = vst [vmem:[%s808_s26 + $0x20] sm:$0xff] (%p50_p3), %v158_v4  ;;  %v166_v8 = vld [vmem:[%s800_s25 + $0x80] sm:$0xff] (%p50_p3)  ;;  %v168_v9 = vld [vmem:[%s800_s25 + $0x88] sm:$0xff] (%p50_p3) }
  0x15   : > { %161 = vst [vmem:[%s808_s26 + $0x28] sm:$0xff] %v160_v5  ;;  %163 = vst [vmem:[%s808_s26 + $0x30] sm:$0xff] %v162_v6  ;;  %v170_v10 = vld [vmem:[%s800_s25 + $0x90] sm:$0xff]  ;;  %v172_v11 = vld [vmem:[%s800_s25 + $0x98] sm:$0xff] }
  0x16   : > { %165 = vst [vmem:[%s808_s26 + $0x38] sm:$0xff] %v164_v7  ;;  %167 = vst [vmem:[%s808_s26 + $0x40] sm:$0xff] %v166_v8  ;;  %v174_v12 = vld [vmem:[%s800_s25 + $0xc0] sm:$0xff]  ;;  %v176_v13 = vld [vmem:[%s800_s25 + $0xc8] sm:$0xff] }
  0x17   : > { %169 = vst [vmem:[%s808_s26 + $0x48] sm:$0xff] %v168_v9  ;;  %171 = vst [vmem:[%s808_s26 + $0x50] sm:$0xff] %v170_v10  ;;  %v178_v14 = vld [vmem:[%s800_s25 + $0xd0] sm:$0xff]  ;;  %v180_v15 = vld [vmem:[%s800_s25 + $0xd8] sm:$0xff] }
  0x18   : > { %173 = vst [vmem:[%s808_s26 + $0x58] sm:$0xff] %v172_v11  ;;  %175 = vst [vmem:[%s808_s26 + $0x60] sm:$0xff] %v174_v12  ;;  %v182_v16 = vld [vmem:[%s800_s25 + $0x100] sm:$0xff]  ;;  %v184_v17 = vld [vmem:[%s800_s25 + $0x108] sm:$0xff] }
  0x19   : > { %177 = vst [vmem:[%s808_s26 + $0x68] sm:$0xff] %v176_v13  ;;  %179 = vst [vmem:[%s808_s26 + $0x70] sm:$0xff] %v178_v14  ;;  %v186_v18 = vld [vmem:[%s800_s25 + $0x110] sm:$0xff]  ;;  %v188_v19 = vld [vmem:[%s800_s25 + $0x118] sm:$0xff] }
  0x1a   : > { %181 = vst [vmem:[%s808_s26 + $0x78] sm:$0xff] %v180_v15  ;;  %183 = vst [vmem:[%s808_s26 + $0x80] sm:$0xff] %v182_v16  ;;  %v190_v20 = vld [vmem:[%s800_s25 + $0x140] sm:$0xff]  ;;  %v192_v21 = vld [vmem:[%s800_s25 + $0x148] sm:$0xff] }
  0x1b   : > { %185 = vst [vmem:[%s808_s26 + $0x88] sm:$0xff] %v184_v17  ;;  %187 = vst [vmem:[%s808_s26 + $0x90] sm:$0xff] %v186_v18  ;;  %v194_v22 = vld [vmem:[%s800_s25 + $0x150] sm:$0xff]  ;;  %v196_v23 = vld [vmem:[%s800_s25 + $0x158] sm:$0xff] }
  0x1c   : > { %189 = vst [vmem:[%s808_s26 + $0x98] sm:$0xff] %v188_v19  ;;  %191 = vst [vmem:[%s808_s26 + $0xa0] sm:$0xff] %v190_v20 }
  0x1d   : > { %193 = vst [vmem:[%s808_s26 + $0xa8] sm:$0xff] %v192_v21  ;;  %195 = vst [vmem:[%s808_s26 + $0xb0] sm:$0xff] %v194_v22 }
  0x1e   : > { %197 = vst [vmem:[%s808_s26 + $0xb8] sm:$0xff] %v196_v23 }
  0x1f PF: > { %p659_p5 = scmp.ge.s32.totalorder %s743_s14, 1  ;;  %p202_p6 = scmp.lt.s32.totalorder %s743_s14, 3 }
  0x21   : > { %p203_p7 = pnand %p659_p5, %p202_p6 }
  0x22   : > { %s209_s27 = sand.u32 (!%p203_p7), 1, %s735_s12   ;;  %v265_v24 = vld [vmem:[%s923_s2] sm:$0xff] (!%p203_p7)  ;;  %v745_v25 = vmov (!%p203_p7), 0   ;;  %vm391_vm0 = vcmask (!%p203_p7), 392192   ;;  %s660_s7 = sshll.u32 (!%p203_p7), %s653_s15, 3 }
  0x23   : > { %206 = sbr.rel (%p203_p7) target bundleno = 287 (0x11f), region = 51  ;;  %427 = vmatprep.mubr.bf16.mxu0 (!%p203_p7), %v745_v25  ;;  %468 = vmatprep.mubr.bf16.mxu1 (!%p203_p7), %v745_v25  ;;  %v240_v60 = vld [vmem:[%s921_s0] sm:$0xf] (!%p203_p7)  ;;  %p234_p8 = scmp.lt.s32.totalorder (!%p203_p7), %s660_s7, 15 }
  0x24   : > { %s694_s30 = smul.u32 (!%p203_p7), 192, %s209_s27  ;;  %720 = vset.pattern.permute.xlu0 (!%p203_p7), %v745_v25 }
  0x25   : > { %268 = vperm.xlu0 (!%p203_p7), %720, %v265_v24  }
  0x26   : > { %s861_s4 = scalar_lea.vmem (!%p203_p7), [#allocation2], %s694_s30 }
  0x27   : > { %v241_v26 = vld [vmem:[%s861_s4] sm:$0xff] (!%p203_p7)  ;;  %v242_v28 = vld [vmem:[%s861_s4 + $0x8] sm:$0xff] (!%p203_p7)  ;;  %v243_v48 = vld [vmem:[%s861_s4 + $0x10] sm:$0xff] (!%p203_p7) }
  0x28   : > { %v245_v27 = vld [vmem:[%s861_s4 + $0x20] sm:$0xff] (!%p203_p7)  ;;  %v246_v30 = vld [vmem:[%s861_s4 + $0x28] sm:$0xff] (!%p203_p7)  ;;  %v247_v49 = vld [vmem:[%s861_s4 + $0x30] sm:$0xff] (!%p203_p7) }
  0x29   : > { %v663_v29 = vcombine.high (!%p203_p7), %v241_v26, %v245_v27  ;;  %v662_v31 = vcombine.low (!%p203_p7), %v241_v26, %v245_v27  ;;  %v249_v32 = vld [vmem:[%s861_s4 + $0x40] sm:$0xff] (!%p203_p7)  ;;  %v665_v34 = vcombine.high (!%p203_p7), %v242_v28, %v246_v30  ;;  %v664_v35 = vcombine.low (!%p203_p7), %v242_v28, %v246_v30  ;;  %v250_v37 = vld [vmem:[%s861_s4 + $0x48] sm:$0xff] (!%p203_p7)  ;;  %v244_v50 = vld [vmem:[%s861_s4 + $0x18] sm:$0xff] (!%p203_p7) }
  0x2a   : > { %v253_v33 = vld [vmem:[%s861_s4 + $0x60] sm:$0xff]  ;;  %v254_v38 = vld [vmem:[%s861_s4 + $0x68] sm:$0xff]  ;;  %v248_v51 = vld [vmem:[%s861_s4 + $0x38] sm:$0xff]  ;;  %v667_v54 = vcombine.high %v243_v48, %v247_v49  ;;  %v666_v61 = vcombine.low %v243_v48, %v247_v49  ;;  %s929_s7 = smov (!%p234_p8, %s660_s7), 15 }
  0x2b   : > { %v671_v36 = vcombine.high %v249_v32, %v253_v33  ;;  %v257_v39 = vld [vmem:[%s861_s4 + $0x80] sm:$0xff]  ;;  %395 = vmatprep.subr.bf16.mxu0 %v663_v29  ;;  %v673_v40 = vcombine.high %v250_v37, %v254_v38  ;;  %v258_v42 = vld [vmem:[%s861_s4 + $0x88] sm:$0xff]  ;;  %436 = vmatprep.subr.bf16.mxu1 %v665_v34  ;;  %v670_v44 = vcombine.low %v249_v32, %v253_v33  ;;  %v251_v56 = vld [vmem:[%s861_s4 + $0x50] sm:$0xff]  ;;  %s661_s8 = sshll.u32 %s929_s7, 3 }
  0x2c   : > { %v261_v41 = vld [vmem:[%s861_s4 + $0xa0] sm:$0xff]  ;;  %v262_v43 = vld [vmem:[%s861_s4 + $0xa8] sm:$0xff]  ;;  %396 = vmatpush1.bf16.msra.mxu0 %v662_v31  ;;  %437 = vmatpush1.bf16.msra.mxu1 %v664_v35  ;;  %v672_v45 = vcombine.low %v250_v37, %v254_v38  ;;  %v669_v55 = vcombine.high %v244_v50, %v248_v51  ;;  %v255_v57 = vld [vmem:[%s861_s4 + $0x70] sm:$0xff]  ;;  %v668_v62 = vcombine.low %v244_v50, %v248_v51  ;;  %s901_s11 = scalar_lea.vmem %s924_s3, %s661_s8 }
  0x2d   : > { %397 = vmatprep.subr.bf16.mxu0 %v671_v36  ;;  %v679_v46 = vcombine.high %v257_v39, %v261_v41  ;;  %438 = vmatprep.subr.bf16.mxu1 %v673_v40  ;;  %v681_v47 = vcombine.high %v258_v42, %v262_v43  ;;  %v678_v52 = vcombine.low %v257_v39, %v261_v41  ;;  %v252_v58 = vld [vmem:[%s861_s4 + $0x58] sm:$0xff]  ;;  %v259_v1 = vld [vmem:[%s861_s4 + $0x90] sm:$0xff] }
  0x2e   : > { %v680_v53 = vcombine.low %v258_v42, %v262_v43  ;;  %v256_v59 = vld [vmem:[%s861_s4 + $0x78] sm:$0xff]  ;;  %v675_v63 = vcombine.high %v251_v56, %v255_v57  ;;  %v263_v2 = vld [vmem:[%s861_s4 + $0xb0] sm:$0xff]  ;;  %v674_v5 = vcombine.low %v251_v56, %v255_v57 }
  0x2f   : > { %v677_v0 = vcombine.high %v252_v58, %v256_v59  ;;  %v260_v3 = vld [vmem:[%s861_s4 + $0x98] sm:$0xff]  ;;  %v676_v6 = vcombine.low %v252_v58, %v256_v59  ;;  %v683_v7 = vcombine.high %v259_v1, %v263_v2  ;;  %v682_v9 = vcombine.low %v259_v1, %v263_v2 }
  0x30   : > { %398 = vmatpush1.bf16.msra.mxu0 %v670_v44  ;;  %439 = vmatpush1.bf16.msra.mxu1 %v672_v45  ;;  %v264_v4 = vld [vmem:[%s861_s4 + $0xb8] sm:$0xff] }
  0x31   : > { %399 = vmatprep.subr.bf16.mxu0 %v679_v46  ;;  %440 = vmatprep.subr.bf16.mxu1 %v681_v47  ;;  %v685_v8 = vcombine.high %v260_v3, %v264_v4  ;;  %v684_v10 = vcombine.low %v260_v3, %v264_v4 }
  0x34   : > { %400 = vmatpush1.bf16.msra.mxu0 %v678_v52  ;;  %441 = vmatpush1.bf16.msra.mxu1 %v680_v53 }
  0x35   : > { %477 = vmatprep.subr.bf16.mxu0 %v667_v54  ;;  %518 = vmatprep.subr.bf16.mxu1 %v669_v55 }
  0x37   : > { %686 = vmatmul.mubr.msk.bf16.vlgmr.msra.gmra.mrb[0].mxu0 %vm391_vm0, %v240_v60  ;;  %687 = vmatmul.mubr.msk.bf16.vlgmr.msra.gmra.mrb[0].mxu1 %vm391_vm0, %v240_v60 }
  0x38   : > { %478 = vmatpush1.bf16.msra.mxu0 %v666_v61  ;;  %519 = vmatpush1.bf16.msra.mxu1 %v668_v62 }
  0x39   : > { %479 = vmatprep.subr.bf16.mxu0 %v675_v63  ;;  %520 = vmatprep.subr.bf16.mxu1 %v677_v0 }
  0x3a   : > { %509 = vmatprep.mubr.bf16.mxu0 %v745_v25  ;;  %550 = vmatprep.mubr.bf16.mxu1 %v745_v25 }
  0x3c   : > { %480 = vmatpush1.bf16.msra.mxu0 %v674_v5  ;;  %521 = vmatpush1.bf16.msra.mxu1 %v676_v6 }
  0x3d   : > { %481 = vmatprep.subr.bf16.mxu0 %v683_v7  ;;  %522 = vmatprep.subr.bf16.mxu1 %v685_v8 }
  0x40   : > { %482 = vmatpush1.bf16.msra.mxu0 %v682_v9  ;;  %523 = vmatpush1.bf16.msra.mxu1 %v684_v10 }
  0x43   : > { %688 = vmatmul.mubr.msk.bf16.vlgmr.msra.gmra.mrb[4].mxu0 %vm391_vm0, %v240_v60  ;;  %689 = vmatmul.mubr.msk.bf16.vlgmr.msra.gmra.mrb[4].mxu1 %vm391_vm0, %v240_v60 }
  0xa4   : > { %v269_v11 = vpop.permute.xlu0 %268 }
 0x10a   : > { %v429_v12 = vpop.f32.mrb[0].mxu0  ;;  %v470_v14 = vpop.f32.mrb[0].mxu1 }
 0x10b   : > { %v430_v13 = vadd.f32 %v429_v12, %v269_v11  ;;  %v431_v15 = vpop.f32.mrb[1].mxu0  ;;  %v471_v16 = vadd.f32 %v470_v14, %v269_v11  ;;  %v472_v18 = vpop.f32.mrb[1].mxu1 }
 0x10c   : > { %v432_v17 = vadd.f32 %v431_v15, %v269_v11  ;;  %v433_v19 = vpop.f32.mrb[2].mxu0  ;;  %v473_v21 = vadd.f32 %v472_v18, %v269_v11  ;;  %v474_v22 = vpop.f32.mrb[2].mxu1 }
 0x10d   : > { %vm559_vm1 = vcmp.ge.f32.partialorder %v430_v13, 0.0  ;;  %v567_v20 = vmul.f32 0.2, %v430_v13  ;;  %v434_v23 = vpop.f32.mrb[3].mxu0  ;;  %vm561_vm2 = vcmp.ge.f32.partialorder %v471_v16, 0.0  ;;  %v475_v28 = vpop.f32.mrb[3].mxu1 }
 0x10e   : > { %v569_v24 = vmul.f32 0.2, %v471_v16  ;;  %vm560_vm3 = vcmp.ge.f32.partialorder %v432_v17, 0.0  ;;  %v568_v25 = vmul.f32 0.2, %v432_v17  ;;  %vm562_vm4 = vcmp.ge.f32.partialorder %v473_v21, 0.0 }
 0x10f   : > { %v575_v26 = vsel %vm559_vm1, %v430_v13, %v567_v20  ;;  %v570_v27 = vmul.f32 0.2, %v473_v21 }
 0x110   : > { %583 = vst [vmem:[%s901_s11] sm:$0xff] %v575_v26  ;;  %v577_v29 = vsel %vm561_vm2, %v471_v16, %v569_v24  ;;  %v576_v30 = vsel %vm560_vm3, %v432_v17, %v568_v25 }
 0x111   : > { %585 = vst [vmem:[%s901_s11 + $0x10] sm:$0xff] %v577_v29  ;;  %584 = vst [vmem:[%s901_s11 + $0x8] sm:$0xff] %v576_v30  ;;  %v578_v31 = vsel %vm562_vm4, %v473_v21, %v570_v27 }
 0x112   : > { %586 = vst [vmem:[%s901_s11 + $0x18] sm:$0xff] %v578_v31 }
 0x116   : > { %v511_v32 = vpop.f32.mrb[4].mxu0  ;;  %v552_v34 = vpop.f32.mrb[4].mxu1 }
 0x117   : > { %v512_v33 = vadd.f32 %v511_v32, %v269_v11  ;;  %v513_v35 = vpop.f32.mrb[5].mxu0  ;;  %v553_v36 = vadd.f32 %v552_v34, %v269_v11  ;;  %v554_v38 = vpop.f32.mrb[5].mxu1 }
 0x118   : > { %v514_v37 = vadd.f32 %v513_v35, %v269_v11  ;;  %v515_v39 = vpop.f32.mrb[6].mxu0  ;;  %v555_v41 = vadd.f32 %v554_v38, %v269_v11  ;;  %v556_v42 = vpop.f32.mrb[6].mxu1 }
 0x119   : > { %vm563_vm5 = vcmp.ge.f32.partialorder %v512_v33, 0.0  ;;  %v571_v40 = vmul.f32 0.2, %v512_v33  ;;  %v516_v43 = vpop.f32.mrb[7].mxu0  ;;  %vm565_vm6 = vcmp.ge.f32.partialorder %v553_v36, 0.0  ;;  %v557_v48 = vpop.f32.mrb[7].mxu1 }
 0x11a   : > { %v573_v44 = vmul.f32 0.2, %v553_v36  ;;  %vm564_vm7 = vcmp.ge.f32.partialorder %v514_v37, 0.0  ;;  %v572_v45 = vmul.f32 0.2, %v514_v37  ;;  %vm566_vm8 = vcmp.ge.f32.partialorder %v555_v41, 0.0 }
 0x11b   : > { %v579_v46 = vsel %vm563_vm5, %v512_v33, %v571_v40  ;;  %v574_v47 = vmul.f32 0.2, %v555_v41 }
 0x11c   : > { %587 = vst [vmem:[%s901_s11 + $0x20] sm:$0xff] %v579_v46  ;;  %v581_v49 = vsel %vm565_vm6, %v553_v36, %v573_v44  ;;  %v580_v50 = vsel %vm564_vm7, %v514_v37, %v572_v45 }
 0x11d   : > { %589 = vst [vmem:[%s901_s11 + $0x30] sm:$0xff] %v581_v49  ;;  %588 = vst [vmem:[%s901_s11 + $0x28] sm:$0xff] %v580_v50  ;;  %v582_v51 = vsel %vm566_vm8, %v555_v41, %v574_v47 }
 0x11e   : > { %590 = vst [vmem:[%s901_s11 + $0x38] sm:$0xff] %v582_v51 }
 0x11f PF: > { %p10_p9 = scmp.ge.s32.totalorder %s783_s16, 4   ;;  %s925_s12 = smov %s739_s13 }
 0x120   : > { %s926_s13 = smov %s792_s19  ;;  %s927_s14 = smov %s783_s16 }
 0x121   :  { %12 = sbr.rel (!%p10_p9) target bundleno = 2 (0x2), region = 90 }

// kernel: critic_forward.8
= control target key start
LH: loop header
LB: loop body
LE: loop exit
PB: predicated region body
PF: predicated region fallthrough
CT: control target
= control target key end

     0   :  { %s657_s12 = smov 0   ;;  %s659_s13 = smov 0   ;;  %s766_s0 = inlined_call_operand.vmem [shape: bf16[16,128], index: 0, kind: input, shape index: {}]   ;;  %s767_s1 = inlined_call_operand.vmem [shape: bf16[128,512], index: 1, kind: input, shape index: {}]   ;;  %s768_s2 = inlined_call_operand.vmem [shape: f32[16,1], index: 2, kind: input, shape index: {}]   ;;  %s769_s3 = inlined_call_operand.vmem [shape: f32[16,512], index: 3, kind: output, shape index: {}]  }
   0x1   :  { %s661_s14 = smov 0  }
   0x2 LB: > { %s527_s15 = sadd.s32 4294967295, %s634_s14   ;;  %s674_s16 = sadd.s32 1, %s634_s14   ;;  %s634_s14 = sphi %s661_s14, %s773_s14   ;;  %s630_s13 = sphi %s659_s13, %s772_s13   ;;  %s626_s12 = sphi %s657_s12, %s771_s12  }
   0x3   : > { %s38_s17 = ssub.s32 %s634_s14, %s674_s16  ;;  %s41_s18 = sadd.s32 1, %s630_s13 }
   0x4   : > { %p39_p0 = scmp.eq.s32.totalorder %s38_s17, 0  ;;  %p48_p1 = scmp.ne.s32.totalorder %s630_s13, %s626_s12 }
   0x5   : > { %p49_p2 = scmp.eq.s32.totalorder %s634_s14, 0  ;;  %p99_p3 = scmp.eq.s32.totalorder %s527_s15, 1 }
   0x6   : > { %s685_s19 = scalar_select %p39_p0, %s630_s13, %s41_s18  }
   0x7   : > { %p50_p4 = por %p49_p2, %p48_p1  ;;  %p687_p5 = por %p99_p3, %p48_p1 }
   0x8   : > { %p530_p6 = scmp.ge.s32.totalorder %s634_s14, 2 }
   0xa   : > { %127 = sbr.rel (%p530_p6) target bundleno = 29 (0x1d), region = 24 }
  0x11   : > { %130 = sbr.rel (!%p50_p4) target bundleno = 29 (0x1d), region = 28  ;;  %s132_s21 = sand.u32 (%p50_p4), 1, %s630_s13  }
  0x12   : > { %s559_s22 = sshll.u32 (%p50_p4), %s634_s14, 3  ;;  %s531_s23 = sshll.u32 (%p50_p4), %s132_s21, 7 }
  0x13   : > { %s697_s26 = scalar_lea.vmem (%p50_p4), %s767_s1, %s559_s22  ;;  %s134_s27 = scalar_lea.vmem (%p50_p4), [#allocation2], %s531_s23 }
  0x14   : > { %v195_v0 = vld [vmem:[%s697_s26] sm:$0xff] (%p50_p4)  ;;  %v197_v1 = vld [vmem:[%s697_s26 + $0x10] sm:$0xff] (%p50_p4) }
  0x15   : > { %v199_v2 = vld [vmem:[%s697_s26 + $0x20] sm:$0xff] (%p50_p4)  ;;  %196 = vst [vmem:[%s134_s27] sm:$0xff] (%p50_p4), %v195_v0  ;;  %198 = vst [vmem:[%s134_s27 + $0x8] sm:$0xff] (%p50_p4), %v197_v1  ;;  %v201_v3 = vld [vmem:[%s697_s26 + $0x30] sm:$0xff] (%p50_p4) }
  0x16   : > { %200 = vst [vmem:[%s134_s27 + $0x10] sm:$0xff] (%p50_p4), %v199_v2  ;;  %v203_v4 = vld [vmem:[%s697_s26 + $0x40] sm:$0xff] (%p50_p4)  ;;  %v205_v5 = vld [vmem:[%s697_s26 + $0x50] sm:$0xff] (%p50_p4)  ;;  %202 = vst [vmem:[%s134_s27 + $0x18] sm:$0xff] (%p50_p4), %v201_v3 }
  0x17   : > { %204 = vst [vmem:[%s134_s27 + $0x20] sm:$0xff] (%p50_p4), %v203_v4  ;;  %206 = vst [vmem:[%s134_s27 + $0x28] sm:$0xff] (%p50_p4), %v205_v5  ;;  %v207_v6 = vld [vmem:[%s697_s26 + $0x60] sm:$0xff] (%p50_p4)  ;;  %v209_v7 = vld [vmem:[%s697_s26 + $0x70] sm:$0xff] (%p50_p4) }
  0x18   : > { %v211_v8 = vld [vmem:[%s697_s26 + $0x80] sm:$0xff]  ;;  %208 = vst [vmem:[%s134_s27 + $0x30] sm:$0xff] %v207_v6  ;;  %210 = vst [vmem:[%s134_s27 + $0x38] sm:$0xff] %v209_v7  ;;  %v213_v9 = vld [vmem:[%s697_s26 + $0x90] sm:$0xff] }
  0x19   : > { %212 = vst [vmem:[%s134_s27 + $0x40] sm:$0xff] %v211_v8  ;;  %v215_v10 = vld [vmem:[%s697_s26 + $0xa0] sm:$0xff]  ;;  %v217_v11 = vld [vmem:[%s697_s26 + $0xb0] sm:$0xff]  ;;  %214 = vst [vmem:[%s134_s27 + $0x48] sm:$0xff] %v213_v9 }
  0x1a   : > { %216 = vst [vmem:[%s134_s27 + $0x50] sm:$0xff] %v215_v10  ;;  %218 = vst [vmem:[%s134_s27 + $0x58] sm:$0xff] %v217_v11  ;;  %v219_v12 = vld [vmem:[%s697_s26 + $0xc0] sm:$0xff]  ;;  %v221_v13 = vld [vmem:[%s697_s26 + $0xd0] sm:$0xff] }
  0x1b   : > { %v223_v14 = vld [vmem:[%s697_s26 + $0xe0] sm:$0xff]  ;;  %220 = vst [vmem:[%s134_s27 + $0x60] sm:$0xff] %v219_v12  ;;  %222 = vst [vmem:[%s134_s27 + $0x68] sm:$0xff] %v221_v13  ;;  %v225_v15 = vld [vmem:[%s697_s26 + $0xf0] sm:$0xff] }
  0x1c   : > { %224 = vst [vmem:[%s134_s27 + $0x70] sm:$0xff] %v223_v14  ;;  %226 = vst [vmem:[%s134_s27 + $0x78] sm:$0xff] %v225_v15 }
  0x1d PF: > { %p534_p7 = scmp.ge.s32.totalorder %s634_s14, 1  ;;  %p231_p8 = scmp.lt.s32.totalorder %s634_s14, 3 }
  0x1f   : > { %p232_p9 = pnand %p534_p7, %p231_p8 }
  0x20   : > { %s238_s28 = sand.u32 (!%p232_p9), 1, %s626_s12   ;;  %v636_v16 = vmov (!%p232_p9), 0   ;;  %v281_v17 = vld [vmem:[%s768_s2] sm:$0xff] (!%p232_p9)  ;;  %v282_v18 = vld [vmem:[%s768_s2 + $0x8] sm:$0xff] (!%p232_p9) }
  0x21   : > { %235 = sbr.rel (%p232_p9) target bundleno = 297 (0x129), region = 66  ;;  %s535_s29 = sshll.u32 (!%p232_p9), %s238_s28, 7  ;;  %411 = vmatprep.mubr.bf16.mxu0 (!%p232_p9), %v636_v16  ;;  %586 = vset.pattern.permute.xlu0 (!%p232_p9), %v636_v16  ;;  %v611_v35 = vld [vmem:[%s766_s0] sm:$0xff] (!%p232_p9)  }
  0x22   : > { %285 = vperm.xlu0 (!%p232_p9), %586, %v281_v17   ;;  %s726_s7 = scalar_lea.vmem (!%p232_p9), [#allocation2], %s535_s29  ;;  %s536_s10 = sshll.u32 (!%p232_p9), %s238_s28, 5 }
  0x23   : > { %v587_v19 = vld [vmem:[%s726_s7 + $0x4] ss:$8 sps:$4 sm:$0xff] (!%p232_p9)   ;;  %v589_v20 = vld [vmem:[%s726_s7] ss:$8 sps:$4 sm:$0xff] (!%p232_p9)   ;;  %v590_v21 = vld [vmem:[%s726_s7 + $0x14] ss:$8 sps:$4 sm:$0xff] (!%p232_p9)  }
  0x24   : > { %379 = vmatprep.subr.bf16.mxu0 (!%p232_p9), %v587_v19  ;;  %v592_v22 = vld [vmem:[%s726_s7 + $0x10] ss:$8 sps:$4 sm:$0xff] (!%p232_p9)   ;;  %v593_v23 = vld [vmem:[%s726_s7 + $0x24] ss:$8 sps:$4 sm:$0xff] (!%p232_p9)   ;;  %v595_v24 = vld [vmem:[%s726_s7 + $0x20] ss:$8 sps:$4 sm:$0xff] (!%p232_p9)  }
  0x25   : > { %380 = vmatpush1.bf16.msra.mxu0 (!%p232_p9), %v589_v20  ;;  %v596_v25 = vld [vmem:[%s726_s7 + $0x34] ss:$8 sps:$4 sm:$0xff] (!%p232_p9)   ;;  %v598_v26 = vld [vmem:[%s726_s7 + $0x30] ss:$8 sps:$4 sm:$0xff] (!%p232_p9)   ;;  %v599_v27 = vld [vmem:[%s726_s7 + $0x44] ss:$8 sps:$4 sm:$0xff] (!%p232_p9)  }
  0x26   : > { %290 = vperm.xlu0 (!%p232_p9), %586, %v282_v18   ;;  %381 = vmatprep.subr.bf16.mxu0 (!%p232_p9), %v590_v21  ;;  %v601_v28 = vld [vmem:[%s726_s7 + $0x40] ss:$8 sps:$4 sm:$0xff] (!%p232_p9)   ;;  %v602_v29 = vld [vmem:[%s726_s7 + $0x54] ss:$8 sps:$4 sm:$0xff] (!%p232_p9)   ;;  %v604_v30 = vld [vmem:[%s726_s7 + $0x50] ss:$8 sps:$4 sm:$0xff] (!%p232_p9)  }
  0x27   : > { %v605_v31 = vld [vmem:[%s726_s7 + $0x64] ss:$8 sps:$4 sm:$0xff] (!%p232_p9)   ;;  %v607_v32 = vld [vmem:[%s726_s7 + $0x60] ss:$8 sps:$4 sm:$0xff] (!%p232_p9)   ;;  %v608_v33 = vld [vmem:[%s726_s7 + $0x74] ss:$8 sps:$4 sm:$0xff] (!%p232_p9)  }
  0x28   : > { %v610_v34 = vld [vmem:[%s726_s7 + $0x70] ss:$8 sps:$4 sm:$0xff]   ;;  %s259_s11 = scalar_lea.vmem [#allocation3], %s536_s10  ;;  %s560_s12 = sshll.u32 (%p687_p5), %s527_s15, 4 }
  0x29   : > { %382 = vmatpush1.bf16.msra.mxu0 %v592_v22  ;;  %s447_s21 = scalar_lea.vmem (%p687_p5), %s769_s3, %s560_s12 }
  0x2a   : > { %383 = vmatprep.subr.bf16.mxu0 %v593_v23 }
  0x2d   : > { %384 = vmatpush1.bf16.msra.mxu0 %v595_v24 }
  0x2e   : > { %385 = vmatprep.subr.bf16.mxu0 %v596_v25 }
  0x31   : > { %386 = vmatpush1.bf16.msra.mxu0 %v598_v26 }
  0x32   : > { %387 = vmatprep.subr.bf16.mxu0 %v599_v27 }
  0x35   : > { %388 = vmatpush1.bf16.msra.mxu0 %v601_v28 }
  0x36   : > { %389 = vmatprep.subr.bf16.mxu0 %v602_v29 }
  0x39   : > { %390 = vmatpush1.bf16.msra.mxu0 %v604_v30 }
  0x3a   : > { %391 = vmatprep.subr.bf16.mxu0 %v605_v31 }
  0x3d   : > { %392 = vmatpush1.bf16.msra.mxu0 %v607_v32 }
  0x3e   : > { %393 = vmatprep.subr.bf16.mxu0 %v608_v33 }
  0x41   : > { %394 = vmatpush1.bf16.msra.mxu0 %v610_v34 }
  0x44   : > { %412 = vmatmul.mubr.bf16.vlgmr.msra.gmra.mrb[0].mxu0 %v611_v35 }
  0xa1   : > { %v286_v36 = vpop.permute.xlu0 %285 }
  0xa5   : > { %v291_v40 = vpop.permute.xlu0 %290 }
 0x117   : > { %v413_v37 = vpop.f32.mrb[0].mxu0 }
 0x118   : > { %v414_v38 = vadd.f32 %v413_v37, %v286_v36  ;;  %v415_v39 = vpop.f32.mrb[1].mxu0 }
 0x119   : > { %v416_v41 = vadd.f32 %v415_v39, %v286_v36  ;;  %v417_v42 = vpop.f32.mrb[2].mxu0 }
 0x11a   : > { %vm422_vm0 = vcmp.ge.f32.partialorder %v414_v38, 0.0  ;;  %v426_v43 = vmul.f32 0.2, %v414_v38  ;;  %v418_v44 = vadd.f32 %v417_v42, %v291_v40  ;;  %v419_v45 = vpop.f32.mrb[3].mxu0  ;;  %444 = sbr.rel (!%p687_p5) target bundleno = 297 (0x129), region = 74 }
 0x11b   : > { %vm423_vm1 = vcmp.ge.f32.partialorder %v416_v41, 0.0  ;;  %v427_v46 = vmul.f32 0.2, %v416_v41  ;;  %v420_v47 = vadd.f32 %v419_v45, %v291_v40 }
 0x11c   : > { %v430_v48 = vsel %vm422_vm0, %v414_v38, %v426_v43  ;;  %vm424_vm2 = vcmp.ge.f32.partialorder %v418_v44, 0.0  ;;  %v428_v49 = vmul.f32 0.2, %v418_v44 }
 0x11d   : > { %434 = vst [vmem:[%s259_s11] sm:$0xff] %v430_v48  ;;  %v431_v50 = vsel %vm423_vm1, %v416_v41, %v427_v46  ;;  %vm425_vm3 = vcmp.ge.f32.partialorder %v420_v47, 0.0  ;;  %v429_v51 = vmul.f32 0.2, %v420_v47 }
 0x11e   : > { %435 = vst [vmem:[%s259_s11 + $0x8] sm:$0xff] %v431_v50  ;;  %v432_v52 = vsel %vm424_vm2, %v418_v44, %v428_v49 }
 0x11f   : > { %436 = vst [vmem:[%s259_s11 + $0x10] sm:$0xff] %v432_v52  ;;  %v433_v53 = vsel %vm425_vm3, %v420_v47, %v429_v51 }
 0x120   : > { %437 = vst [vmem:[%s259_s11 + $0x18] sm:$0xff] %v433_v53 }
 0x124   : > { %v460_v54 = vld [vmem:[%s259_s11] sm:$0xff] }
 0x125   : > { %v462_v55 = vld [vmem:[%s259_s11 + $0x8] sm:$0xff]  ;;  %461 = vst [vmem:[%s447_s21] sm:$0xff] %v460_v54 }
 0x126   : > { %v464_v56 = vld [vmem:[%s259_s11 + $0x10] sm:$0xff]  ;;  %463 = vst [vmem:[%s447_s21 + $0x8] sm:$0xff] %v462_v55 }
 0x127   : > { %v466_v57 = vld [vmem:[%s259_s11 + $0x18] sm:$0xff]  ;;  %465 = vst [vmem:[%s447_s21 + $0x20] sm:$0xff] %v464_v56 }
 0x128   : > { %467 = vst [vmem:[%s447_s21 + $0x28] sm:$0xff] %v466_v57 }
 0x129 PF: > { %p10_p10 = scmp.ge.s32.totalorder %s674_s16, 4   ;;  %s771_s12 = smov %s630_s13 }
 0x12a   : > { %s772_s13 = smov %s685_s19  ;;  %s773_s14 = smov %s674_s16 }
 0x12b   :  { %12 = sbr.rel (!%p10_p10) target bundleno = 2 (0x2), region = 128 }

// kernel: critic_forward.9
= control target key start
LH: loop header
LB: loop body
LE: loop exit
PB: predicated region body
PF: predicated region fallthrough
CT: control target
= control target key end

     0   :  { %v349_v1 = vmov 0   ;;  %s454_s1 = inlined_call_operand.vmem [shape: bf16[256,128], index: 1, kind: input, shape index: {}]   ;;  %s455_s0 = inlined_call_operand.vmem [shape: bf16[32,256], index: 0, kind: input, shape index: {}]   ;;  %s456_s2 = inlined_call_operand.vmem [shape: f32[32,1], index: 2, kind: input, shape index: {}]   ;;  %s457_s3 = inlined_call_operand.vmem [shape: f32[32,128], index: 3, kind: output, shape index: {}]  }
   0x1   :  { %v327_v0 = vld [vmem:[%s454_s1 + $0x40] sm:$0xff]   ;;  %326 = vset.pattern.permute.xlu1 %v349_v1  ;;  %325 = vset.pattern.permute.xlu0 %v349_v1  ;;  %v329_v3 = vld [vmem:[%s454_s1 + $0x48] sm:$0xff]   ;;  %v331_v5 = vld [vmem:[%s454_s1 + $0x50] sm:$0xff]  }
   0x2   :  { %v328_v2 = vld [vmem:[%s454_s1] sm:$0xff]   ;;  %280 = vmatprep.subr.bf16.mxu0 %v327_v0  ;;  %308 = vmatprep.subr.bf16.mxu1 %v327_v0  ;;  %v330_v4 = vld [vmem:[%s454_s1 + $0x8] sm:$0xff]   ;;  %v332_v6 = vld [vmem:[%s454_s1 + $0x10] sm:$0xff]  }
   0x3   :  { %281 = vmatpush3.bf16.msra.mxu0 %v328_v2  ;;  %316 = vmatpush3.bf16.msra.mxu1 %v328_v2  ;;  %v333_v7 = vld [vmem:[%s454_s1 + $0x58] sm:$0xff]   ;;  %v335_v9 = vld [vmem:[%s454_s1 + $0x60] sm:$0xff]   ;;  %v337_v11 = vld [vmem:[%s454_s1 + $0x68] sm:$0xff]  }
   0x4   :  { %282 = vmatprep.subr.bf16.mxu0 %v329_v3  ;;  %309 = vmatprep.subr.bf16.mxu1 %v329_v3  ;;  %v334_v8 = vld [vmem:[%s454_s1 + $0x18] sm:$0xff]   ;;  %v336_v10 = vld [vmem:[%s454_s1 + $0x20] sm:$0xff]   ;;  %v338_v14 = vld [vmem:[%s454_s1 + $0x28] sm:$0xff]  }
   0x5   :  { %v345_v12 = vld [vmem:[%s455_s0 + $0x4] ss:$8 sps:$4 sm:$0xff]   ;;  %v348_v13 = vld [vmem:[%s455_s0 + $0x14] ss:$8 sps:$4 sm:$0xff]   ;;  %v343_v23 = vld [vmem:[%s455_s0] ss:$8 sps:$4 sm:$0xff]  }
   0x6   :  { %v53_v15 = vld [vmem:[%s456_s2 + $0x10] sm:$0xff]  ;;  %v51_v16 = vld [vmem:[%s456_s2] sm:$0xff]  ;;  %223 = vmatprep.mubr.bf16.mxu0 %v345_v12  ;;  %231 = vmatprep.mubr.bf16.mxu1 %v348_v13  ;;  %v54_v19 = vld [vmem:[%s456_s2 + $0x18] sm:$0xff] }
   0x7   :  { %283 = vmatpush3.bf16.msra.mxu0 %v330_v4  ;;  %317 = vmatpush3.bf16.msra.mxu1 %v330_v4  ;;  %v339_v17 = vld [vmem:[%s454_s1 + $0x70] sm:$0xff]   ;;  %v52_v20 = vld [vmem:[%s456_s2 + $0x8] sm:$0xff]  ;;  %v341_v21 = vld [vmem:[%s454_s1 + $0x78] sm:$0xff]  }
   0x8   :  { %284 = vmatprep.subr.bf16.mxu0 %v331_v5  ;;  %310 = vmatprep.subr.bf16.mxu1 %v331_v5  ;;  %v340_v18 = vld [vmem:[%s454_s1 + $0x30] sm:$0xff]   ;;  %v342_v22 = vld [vmem:[%s454_s1 + $0x38] sm:$0xff]  }
   0x9   :  { %67 = vperm.xlu1 %326, %v53_v15   ;;  %57 = vperm.xlu0 %325, %v51_v16   ;;  %v346_v24 = vld [vmem:[%s455_s0 + $0x10] ss:$8 sps:$4 sm:$0xff]  }
   0xb   :  { %285 = vmatpush3.bf16.msra.mxu0 %v332_v6  ;;  %318 = vmatpush3.bf16.msra.mxu1 %v332_v6 }
   0xc   :  { %286 = vmatprep.subr.bf16.mxu0 %v333_v7  ;;  %311 = vmatprep.subr.bf16.mxu1 %v333_v7 }
   0xd   :  { %72 = vperm.xlu1 %326, %v54_v19   ;;  %62 = vperm.xlu0 %325, %v52_v20  }
   0xf   :  { %287 = vmatpush3.bf16.msra.mxu0 %v334_v8  ;;  %319 = vmatpush3.bf16.msra.mxu1 %v334_v8 }
  0x10   :  { %288 = vmatprep.subr.bf16.mxu0 %v335_v9  ;;  %312 = vmatprep.subr.bf16.mxu1 %v335_v9 }
  0x13   :  { %289 = vmatpush3.bf16.msra.mxu0 %v336_v10  ;;  %320 = vmatpush3.bf16.msra.mxu1 %v336_v10 }
  0x14   :  { %290 = vmatprep.subr.bf16.mxu0 %v337_v11  ;;  %313 = vmatprep.subr.bf16.mxu1 %v337_v11 }
  0x17   :  { %291 = vmatpush3.bf16.msra.mxu0 %v338_v14  ;;  %321 = vmatpush3.bf16.msra.mxu1 %v338_v14 }
  0x18   :  { %292 = vmatprep.subr.bf16.mxu0 %v339_v17  ;;  %314 = vmatprep.subr.bf16.mxu1 %v339_v17 }
  0x1b   :  { %293 = vmatpush3.bf16.msra.mxu0 %v340_v18  ;;  %322 = vmatpush3.bf16.msra.mxu1 %v340_v18 }
  0x1c   :  { %294 = vmatprep.subr.bf16.mxu0 %v341_v21  ;;  %315 = vmatprep.subr.bf16.mxu1 %v341_v21 }
  0x1f   :  { %295 = vmatpush3.bf16.msra.mxu0 %v342_v22  ;;  %323 = vmatpush3.bf16.msra.mxu1 %v342_v22 }
  0x22   :  { %224 = vmatmul.mubr.bf16.vlgmr.msra.gmra.mrb[0].mxu0 %v343_v23  ;;  %232 = vmatmul.mubr.bf16.vlgmr.msra.gmra.mrb[0].mxu1 %v346_v24 }
  0x88   :  { %v68_v25 = vpop.permute.xlu1 %67  ;;  %v58_v26 = vpop.permute.xlu0 %57 }
  0x8c   :  { %v73_v41 = vpop.permute.xlu1 %72  ;;  %v63_v42 = vpop.permute.xlu0 %62 }
  0xf5   :  { %v296_v27 = vpop.f32.mrb[0].mxu0  ;;  %v302_v28 = vpop.f32.mrb[0].mxu1 }
  0xf6   :  { %v297_v29 = vpop.f32.mrb[1].mxu0  ;;  %v303_v30 = vpop.f32.mrb[1].mxu1 }
  0xf7   :  { %v298_v31 = vadd.f32 %v297_v29, %v296_v27  ;;  %v304_v32 = vadd.f32 %v303_v30, %v302_v28  ;;  %v299_v33 = vpop.f32.mrb[2].mxu0  ;;  %v305_v34 = vpop.f32.mrb[2].mxu1 }
  0xf8   :  { %v300_v35 = vpop.f32.mrb[3].mxu0  ;;  %v306_v36 = vpop.f32.mrb[3].mxu1 }
  0xf9   :  { %v226_v37 = vadd.f32 %v298_v31, %v58_v26  ;;  %v234_v38 = vadd.f32 %v304_v32, %v68_v25  ;;  %v301_v39 = vadd.f32 %v300_v35, %v299_v33  ;;  %v307_v40 = vadd.f32 %v306_v36, %v305_v34 }
  0xfb   :  { %vm240_vm0 = vcmp.ge.f32.partialorder %v226_v37, 0.0  ;;  %v244_v43 = vmul.f32 0.2, %v226_v37  ;;  %vm242_vm1 = vcmp.ge.f32.partialorder %v234_v38, 0.0  ;;  %v246_v44 = vmul.f32 0.2, %v234_v38 }
  0xfc   :  { %v229_v45 = vadd.f32 %v301_v39, %v63_v42  ;;  %v237_v46 = vadd.f32 %v307_v40, %v73_v41 }
  0xfd   :  { %v248_v47 = vsel %vm240_vm0, %v226_v37, %v244_v43  ;;  %v250_v48 = vsel %vm242_vm1, %v234_v38, %v246_v44 }
  0xfe   :  { %252 = vst [vmem:[%s457_s3] sm:$0xff] %v248_v47  ;;  %254 = vst [vmem:[%s457_s3 + $0x10] sm:$0xff] %v250_v48  ;;  %vm241_vm2 = vcmp.ge.f32.partialorder %v229_v45, 0.0  ;;  %v245_v49 = vmul.f32 0.2, %v229_v45  ;;  %vm243_vm3 = vcmp.ge.f32.partialorder %v237_v46, 0.0 }
  0xff   :  { %v247_v50 = vmul.f32 0.2, %v237_v46 }
 0x100   :  { %v249_v51 = vsel %vm241_vm2, %v229_v45, %v245_v49 }
 0x101   :  { %v251_v52 = vsel %vm243_vm3, %v237_v46, %v247_v50  ;;  %253 = vst [vmem:[%s457_s3 + $0x8] sm:$0xff] %v249_v51 }
 0x102   :  { %255 = vst [vmem:[%s457_s3 + $0x18] sm:$0xff] %v251_v52 }

// kernel: critic_forward.10
= control target key start
LH: loop header
LB: loop body
LE: loop exit
PB: predicated region body
PF: predicated region fallthrough
CT: control target
= control target key end

     0   :  { %v584_v3 = vmov 0   ;;  %vm392_vm0 = vcmask 261120   ;;  %s949_s1 = inlined_call_operand.vmem [shape: f32[512,32], index: 1, kind: input, shape index: {}]   ;;  %s950_s0 = inlined_call_operand.vmem [shape: f32[64,512], index: 0, kind: input, shape index: {}]   ;;  %s951_s2 = inlined_call_operand.vmem [shape: f32[64,1], index: 2, kind: input, shape index: {}]   ;;  %s952_s3 = inlined_call_operand.vmem [shape: f32[64,32], index: 3, kind: output, shape index: {}]  }
   0x1   :  { %v62_v0 = vld [vmem:[%s949_s1 + $0x80] sm:$0xff]  ;;  %v63_v1 = vld [vmem:[%s949_s1 + $0x88] sm:$0xff]  ;;  %582 = vset.pattern.permute.xlu0 %v584_v3  ;;  %583 = vset.pattern.permute.xlu1 %v584_v3  ;;  %v64_v12 = vld [vmem:[%s949_s1 + $0x90] sm:$0xff] }
   0x2   :  { %v46_v2 = vld [vmem:[%s949_s1] sm:$0xff]  ;;  %v517_v4 = vpack.c.bf16 %v63_v1, %v62_v0  ;;  %v47_v5 = vld [vmem:[%s949_s1 + $0x8] sm:$0xff]  ;;  %v65_v14 = vld [vmem:[%s949_s1 + $0x98] sm:$0xff] }
   0x3   :  { %v94_v6 = vld [vmem:[%s949_s1 + $0x180] sm:$0xff]  ;;  %v95_v7 = vld [vmem:[%s949_s1 + $0x188] sm:$0xff]  ;;  %v519_v8 = vpack.c.bf16 %v47_v5, %v46_v2  ;;  %v48_v15 = vld [vmem:[%s949_s1 + $0x10] sm:$0xff]  ;;  %v521_v17 = vpack.c.bf16 %v65_v14, %v64_v12 }
   0x4   :  { %v549_v9 = vpack.c.bf16 %v95_v7, %v94_v6  ;;  %v78_v10 = vld [vmem:[%s949_s1 + $0x100] sm:$0xff]  ;;  %v79_v11 = vld [vmem:[%s949_s1 + $0x108] sm:$0xff]  ;;  %518 = vmatprep.subr.bf16.mxu0 %v517_v4  ;;  %v49_v16 = vld [vmem:[%s949_s1 + $0x18] sm:$0xff] }
   0x5   :  { %v551_v13 = vpack.c.bf16 %v79_v11, %v78_v10  ;;  %520 = vmatpush3.bf16.msra.mxu0 %v519_v8  ;;  %v523_v18 = vpack.c.bf16 %v49_v16, %v48_v15  ;;  %v96_v19 = vld [vmem:[%s949_s1 + $0x190] sm:$0xff]  ;;  %v97_v20 = vld [vmem:[%s949_s1 + $0x198] sm:$0xff]  ;;  %v66_v24 = vld [vmem:[%s949_s1 + $0xa0] sm:$0xff] }
   0x6   :  { %550 = vmatprep.subr.bf16.mxu1 %v549_v9  ;;  %v80_v21 = vld [vmem:[%s949_s1 + $0x110] sm:$0xff]  ;;  %v553_v22 = vpack.c.bf16 %v97_v20, %v96_v19  ;;  %v81_v23 = vld [vmem:[%s949_s1 + $0x118] sm:$0xff]  ;;  %v67_v25 = vld [vmem:[%s949_s1 + $0xa8] sm:$0xff]  ;;  %522 = vmatprep.subr.bf16.mxu0 %v521_v17 }
   0x7   :  { %552 = vmatpush3.bf16.msra.mxu1 %v551_v13  ;;  %v555_v26 = vpack.c.bf16 %v81_v23, %v80_v21  ;;  %v525_v27 = vpack.c.bf16 %v67_v25, %v66_v24  ;;  %v50_v28 = vld [vmem:[%s949_s1 + $0x20] sm:$0xff]  ;;  %v51_v29 = vld [vmem:[%s949_s1 + $0x28] sm:$0xff]  ;;  %v68_v36 = vld [vmem:[%s949_s1 + $0xb0] sm:$0xff] }
   0x8   :  { %v98_v30 = vld [vmem:[%s949_s1 + $0x1a0] sm:$0xff]  ;;  %554 = vmatprep.subr.bf16.mxu1 %v553_v22  ;;  %v99_v31 = vld [vmem:[%s949_s1 + $0x1a8] sm:$0xff]  ;;  %v527_v34 = vpack.c.bf16 %v51_v29, %v50_v28  ;;  %v69_v37 = vld [vmem:[%s949_s1 + $0xb8] sm:$0xff] }
   0x9   :  { %v82_v32 = vld [vmem:[%s949_s1 + $0x120] sm:$0xff]  ;;  %v83_v33 = vld [vmem:[%s949_s1 + $0x128] sm:$0xff]  ;;  %524 = vmatpush3.bf16.msra.mxu0 %v523_v18  ;;  %v557_v35 = vpack.c.bf16 %v99_v31, %v98_v30  ;;  %v52_v38 = vld [vmem:[%s949_s1 + $0x30] sm:$0xff]  ;;  %v529_v40 = vpack.c.bf16 %v69_v37, %v68_v36 }
   0xa   :  { %526 = vmatprep.subr.bf16.mxu0 %v525_v27  ;;  %v559_v39 = vpack.c.bf16 %v83_v33, %v82_v32  ;;  %v53_v41 = vld [vmem:[%s949_s1 + $0x38] sm:$0xff]  ;;  %v100_v42 = vld [vmem:[%s949_s1 + $0x1b0] sm:$0xff]  ;;  %v70_v47 = vld [vmem:[%s949_s1 + $0xc0] sm:$0xff] }
   0xb   :  { %556 = vmatpush3.bf16.msra.mxu1 %v555_v26  ;;  %v101_v43 = vld [vmem:[%s949_s1 + $0x1b8] sm:$0xff]  ;;  %v84_v45 = vld [vmem:[%s949_s1 + $0x130] sm:$0xff]  ;;  %v71_v48 = vld [vmem:[%s949_s1 + $0xc8] sm:$0xff]  ;;  %v531_v49 = vpack.c.bf16 %v53_v41, %v52_v38 }
   0xc   :  { %558 = vmatprep.subr.bf16.mxu1 %v557_v35  ;;  %v561_v44 = vpack.c.bf16 %v101_v43, %v100_v42  ;;  %v85_v46 = vld [vmem:[%s949_s1 + $0x138] sm:$0xff]  ;;  %v102_v50 = vld [vmem:[%s949_s1 + $0x1c0] sm:$0xff]  ;;  %v103_v51 = vld [vmem:[%s949_s1 + $0x1c8] sm:$0xff]  ;;  %v533_v53 = vpack.c.bf16 %v71_v48, %v70_v47 }
   0xd   :  { %528 = vmatpush3.bf16.msra.mxu0 %v527_v34  ;;  %v563_v52 = vpack.c.bf16 %v85_v46, %v84_v45  ;;  %v54_v54 = vld [vmem:[%s949_s1 + $0x40] sm:$0xff]  ;;  %v55_v55 = vld [vmem:[%s949_s1 + $0x48] sm:$0xff]  ;;  %v565_v57 = vpack.c.bf16 %v103_v51, %v102_v50  ;;  %v72_v59 = vld [vmem:[%s949_s1 + $0xd0] sm:$0xff] }
   0xe   :  { %530 = vmatprep.subr.bf16.mxu0 %v529_v40  ;;  %v86_v56 = vld [vmem:[%s949_s1 + $0x140] sm:$0xff]  ;;  %v87_v58 = vld [vmem:[%s949_s1 + $0x148] sm:$0xff]  ;;  %v73_v60 = vld [vmem:[%s949_s1 + $0xd8] sm:$0xff]  ;;  %v535_v63 = vpack.c.bf16 %v55_v55, %v54_v54 }
   0xf   :  { %560 = vmatpush3.bf16.msra.mxu1 %v559_v39  ;;  %v104_v61 = vld [vmem:[%s949_s1 + $0x1d0] sm:$0xff]  ;;  %v105_v62 = vld [vmem:[%s949_s1 + $0x1d8] sm:$0xff]  ;;  %v567_v0 = vpack.c.bf16 %v87_v58, %v86_v56  ;;  %v537_v1 = vpack.c.bf16 %v73_v60, %v72_v59  ;;  %v74_v7 = vld [vmem:[%s949_s1 + $0xe0] sm:$0xff] }
  0x10   :  { %562 = vmatprep.subr.bf16.mxu1 %v561_v44  ;;  %v56_v2 = vld [vmem:[%s949_s1 + $0x50] sm:$0xff]  ;;  %v57_v3 = vld [vmem:[%s949_s1 + $0x58] sm:$0xff]  ;;  %v569_v5 = vpack.c.bf16 %v105_v62, %v104_v61  ;;  %v75_v8 = vld [vmem:[%s949_s1 + $0xe8] sm:$0xff] }
  0x11   :  { %532 = vmatpush3.bf16.msra.mxu0 %v531_v49  ;;  %v88_v4 = vld [vmem:[%s949_s1 + $0x150] sm:$0xff]  ;;  %v89_v6 = vld [vmem:[%s949_s1 + $0x158] sm:$0xff]  ;;  %v106_v9 = vld [vmem:[%s949_s1 + $0x1e0] sm:$0xff]  ;;  %v539_v11 = vpack.c.bf16 %v57_v3, %v56_v2  ;;  %v541_v15 = vpack.c.bf16 %v75_v8, %v74_v7 }
  0x12   :  { %534 = vmatprep.subr.bf16.mxu0 %v533_v53  ;;  %v107_v10 = vld [vmem:[%s949_s1 + $0x1e8] sm:$0xff]  ;;  %v58_v12 = vld [vmem:[%s949_s1 + $0x60] sm:$0xff]  ;;  %v571_v14 = vpack.c.bf16 %v89_v6, %v88_v4  ;;  %v76_v20 = vld [vmem:[%s949_s1 + $0xf0] sm:$0xff] }
  0x13   :  { %564 = vmatpush3.bf16.msra.mxu1 %v563_v52  ;;  %v59_v13 = vld [vmem:[%s949_s1 + $0x68] sm:$0xff]  ;;  %v90_v16 = vld [vmem:[%s949_s1 + $0x160] sm:$0xff]  ;;  %v573_v19 = vpack.c.bf16 %v107_v10, %v106_v9  ;;  %v77_v21 = vld [vmem:[%s949_s1 + $0xf8] sm:$0xff] }
  0x14   :  { %566 = vmatprep.subr.bf16.mxu1 %v565_v57  ;;  %v91_v17 = vld [vmem:[%s949_s1 + $0x168] sm:$0xff]  ;;  %v17_v22 = vld [vmem:[%s950_s0 + $0x18] sm:$0xff]  ;;  %v108_v23 = vld [vmem:[%s949_s1 + $0x1f0] sm:$0xff]  ;;  %v543_v25 = vpack.c.bf16 %v59_v13, %v58_v12  ;;  %v545_v27 = vpack.c.bf16 %v77_v21, %v76_v20 }
  0x15   :  { %536 = vmatpush3.bf16.msra.mxu0 %v535_v63  ;;  %v15_v18 = vld [vmem:[%s950_s0 + $0x8] sm:$0xff]  ;;  %v109_v24 = vld [vmem:[%s949_s1 + $0x1f8] sm:$0xff]  ;;  %327 = vmatprep.mubr.f32.mxu1 %v17_v22  ;;  %v575_v26 = vpack.c.bf16 %v91_v17, %v90_v16  ;;  %v60_v28 = vld [vmem:[%s949_s1 + $0x70] sm:$0xff] }
  0x16   :  { %538 = vmatprep.subr.bf16.mxu0 %v537_v1  ;;  %222 = vmatprep.mubr.f32.mxu0 %v15_v18  ;;  %v61_v29 = vld [vmem:[%s949_s1 + $0x78] sm:$0xff]  ;;  %v577_v30 = vpack.c.bf16 %v109_v24, %v108_v23  ;;  %v92_v31 = vld [vmem:[%s949_s1 + $0x170] sm:$0xff]  ;;  %v14_v35 = vld [vmem:[%s950_s0] sm:$0xff] }
  0x17   :  { %568 = vmatpush3.bf16.msra.mxu1 %v567_v0  ;;  %v93_v32 = vld [vmem:[%s949_s1 + $0x178] sm:$0xff]  ;;  %v547_v33 = vpack.c.bf16 %v61_v29, %v60_v28  ;;  %v110_v36 = vld [vmem:[%s951_s2] sm:$0xff]  ;;  %v112_v37 = vld [vmem:[%s951_s2 + $0x10] sm:$0xff] }
  0x18   :  { %570 = vmatprep.subr.bf16.mxu1 %v569_v5  ;;  %v579_v34 = vpack.c.bf16 %v93_v32, %v92_v31  ;;  %v16_v38 = vld [vmem:[%s950_s0 + $0x10] sm:$0xff]  ;;  %v19_v39 = vld [vmem:[%s950_s0 + $0x28] sm:$0xff]  ;;  %120 = vperm.xlu0 %582, %v110_v36   ;;  %v21_v40 = vld [vmem:[%s950_s0 + $0x38] sm:$0xff] }
  0x19   :  { %540 = vmatpush3.bf16.msra.mxu0 %v539_v11  ;;  %130 = vperm.xlu1 %583, %v112_v37   ;;  %v111_v41 = vld [vmem:[%s951_s2 + $0x8] sm:$0xff]  ;;  %v113_v42 = vld [vmem:[%s951_s2 + $0x18] sm:$0xff]  ;;  %v18_v43 = vld [vmem:[%s950_s0 + $0x20] sm:$0xff] }
  0x1a   :  { %542 = vmatprep.subr.bf16.mxu0 %v541_v15  ;;  %v20_v44 = vld [vmem:[%s950_s0 + $0x30] sm:$0xff]  ;;  %v23_v45 = vld [vmem:[%s950_s0 + $0x48] sm:$0xff]  ;;  %v25_v46 = vld [vmem:[%s950_s0 + $0x58] sm:$0xff] }
  0x1b   :  { %572 = vmatpush3.bf16.msra.mxu1 %v571_v14  ;;  %v114_v47 = vld [vmem:[%s951_s2 + $0x20] sm:$0xff]  ;;  %v115_v48 = vld [vmem:[%s951_s2 + $0x28] sm:$0xff]  ;;  %v24_v50 = vld [vmem:[%s950_s0 + $0x50] sm:$0xff] }
  0x1c   :  { %574 = vmatprep.subr.bf16.mxu1 %v573_v19  ;;  %125 = vperm.xlu0 %582, %v111_v41   ;;  %v22_v49 = vld [vmem:[%s950_s0 + $0x40] sm:$0xff]  ;;  %v27_v51 = vld [vmem:[%s950_s0 + $0x68] sm:$0xff]  ;;  %v29_v52 = vld [vmem:[%s950_s0 + $0x78] sm:$0xff] }
  0x1d   :  { %544 = vmatpush3.bf16.msra.mxu0 %v543_v25  ;;  %135 = vperm.xlu1 %583, %v113_v42   ;;  %v116_v53 = vld [vmem:[%s951_s2 + $0x30] sm:$0xff]  ;;  %v117_v54 = vld [vmem:[%s951_s2 + $0x38] sm:$0xff]  ;;  %v26_v55 = vld [vmem:[%s950_s0 + $0x60] sm:$0xff] }
  0x1e   :  { %546 = vmatprep.subr.bf16.mxu0 %v545_v27  ;;  %v28_v56 = vld [vmem:[%s950_s0 + $0x70] sm:$0xff]  ;;  %v31_v57 = vld [vmem:[%s950_s0 + $0x88] sm:$0xff]  ;;  %v33_v58 = vld [vmem:[%s950_s0 + $0x98] sm:$0xff] }
  0x1f   :  { %576 = vmatpush3.bf16.msra.mxu1 %v575_v26  ;;  %v30_v59 = vld [vmem:[%s950_s0 + $0x80] sm:$0xff]  ;;  %v32_v60 = vld [vmem:[%s950_s0 + $0x90] sm:$0xff]  ;;  %v35_v61 = vld [vmem:[%s950_s0 + $0xa8] sm:$0xff] }
  0x20   :  { %578 = vmatprep.subr.bf16.mxu1 %v577_v30  ;;  %140 = vperm.xlu0 %582, %v114_v47   ;;  %v37_v62 = vld [vmem:[%s950_s0 + $0xb8] sm:$0xff]  ;;  %v34_v63 = vld [vmem:[%s950_s0 + $0xa0] sm:$0xff]  ;;  %v36_v0 = vld [vmem:[%s950_s0 + $0xb0] sm:$0xff] }
  0x21   :  { %548 = vmatpush3.bf16.msra.mxu0 %v547_v33  ;;  %145 = vperm.xlu1 %583, %v115_v48   ;;  %v39_v1 = vld [vmem:[%s950_s0 + $0xc8] sm:$0xff]  ;;  %v41_v2 = vld [vmem:[%s950_s0 + $0xd8] sm:$0xff]  ;;  %v38_v3 = vld [vmem:[%s950_s0 + $0xc0] sm:$0xff] }
  0x22   :  { %v40_v4 = vld [vmem:[%s950_s0 + $0xd0] sm:$0xff]  ;;  %v43_v5 = vld [vmem:[%s950_s0 + $0xe8] sm:$0xff]  ;;  %v45_v6 = vld [vmem:[%s950_s0 + $0xf8] sm:$0xff] }
  0x23   :  { %580 = vmatpush3.bf16.msra.mxu1 %v579_v34  ;;  %v42_v7 = vld [vmem:[%s950_s0 + $0xe0] sm:$0xff]  ;;  %v44_v8 = vld [vmem:[%s950_s0 + $0xf0] sm:$0xff] }
  0x24   :  { %223 = vmatmul.mubr.f32.vlgmr.msra.gmra.mrb[0].mxu0 %v14_v35  ;;  %150 = vperm.xlu0 %582, %v116_v53  }
  0x25   :  { %227 = vmatprep.mubr.f32.mxu0 %v19_v39  ;;  %155 = vperm.xlu1 %583, %v117_v54  }
  0x26   :  { %328 = vmatmul.mubr.f32.vlgmr.msra.gmra.mrb[0].mxu1 %v16_v38 }
  0x27   :  { %332 = vmatprep.mubr.f32.mxu1 %v21_v40 }
  0x28   :  { %228 = vmatmul.mubr.f32.gmra.mrb[2].mxu0 %v18_v43 }
  0x29   :  { %232 = vmatprep.mubr.f32.mxu0 %v23_v45 }
  0x2a   :  { %333 = vmatmul.mubr.f32.gmra.mrb[2].mxu1 %v20_v44 }
  0x2b   :  { %337 = vmatprep.mubr.f32.mxu1 %v25_v46 }
  0x2c   :  { %233 = vmatmul.mubr.f32.gmra.mrb[4].mxu0 %v22_v49 }
  0x2d   :  { %237 = vmatprep.mubr.f32.mxu0 %v27_v51 }
  0x2e   :  { %338 = vmatmul.mubr.f32.gmra.mrb[4].mxu1 %v24_v50 }
  0x2f   :  { %342 = vmatprep.mubr.f32.mxu1 %v29_v52 }
  0x30   :  { %238 = vmatmul.mubr.f32.gmra.mrb[6].mxu0 %v26_v55 }
  0x31   :  { %242 = vmatprep.mubr.f32.mxu0 %v31_v57 }
  0x32   :  { %343 = vmatmul.mubr.f32.gmra.mrb[6].mxu1 %v28_v56 }
  0x33   :  { %347 = vmatprep.mubr.f32.mxu1 %v33_v58 }
  0x34   :  { %243 = vmatmul.mubr.f32.gmra.mrb[8].mxu0 %v30_v59 }
  0x35   :  { %247 = vmatprep.mubr.f32.mxu0 %v35_v61 }
  0x36   :  { %348 = vmatmul.mubr.f32.gmra.mrb[8].mxu1 %v32_v60 }
  0x37   :  { %352 = vmatprep.mubr.f32.mxu1 %v37_v62 }
  0x38   :  { %248 = vmatmul.mubr.f32.gmra.mrb[10].mxu0 %v34_v63 }
  0x39   :  { %252 = vmatprep.mubr.f32.mxu0 %v39_v1 }
  0x3a   :  { %353 = vmatmul.mubr.f32.gmra.mrb[10].mxu1 %v36_v0 }
  0x3b   :  { %357 = vmatprep.mubr.f32.mxu1 %v41_v2 }
  0x3c   :  { %253 = vmatmul.mubr.f32.gmra.mrb[12].mxu0 %v38_v3 }
  0x3d   :  { %257 = vmatprep.mubr.f32.mxu0 %v43_v5 }
  0x3e   :  { %358 = vmatmul.mubr.f32.gmra.mrb[12].mxu1 %v40_v4 }
  0x3f   :  { %362 = vmatprep.mubr.f32.mxu1 %v45_v6 }
  0x40   :  { %258 = vmatmul.mubr.f32.gmra.mrb[14].mxu0 %v42_v7 }
  0x42   :  { %363 = vmatmul.mubr.f32.gmra.mrb[14].mxu1 %v44_v8 }
  0x97   :  { %v121_v9 = vpop.permute.xlu0 %120 }
  0x98   :  { %v131_v26 = vpop.permute.xlu1 %130 }
  0x9b   :  { %v126_v18 = vpop.permute.xlu0 %125 }
  0x9c   :  { %v136_v45 = vpop.permute.xlu1 %135 }
  0x9f   :  { %v141_v56 = vpop.permute.xlu0 %140 }
  0xa0   :  { %v146_v3 = vpop.permute.xlu1 %145 }
  0xf7   :  { %v437_v10 = vpop.f32.mrb[0].mxu0 }
  0xf8   :  { %v438_v11 = vpop.f32.mrb[1].mxu0 }
  0xf9   :  { %v493_v12 = vpop.f32.mrb[0].mxu1  ;;  %v439_v13 = vadd.f32 %v438_v11, %v437_v10 }
  0xfa   :  { %v494_v14 = vpop.f32.mrb[1].mxu1 }
  0xfb   :  { %v495_v15 = vadd.f32 %v494_v14, %v493_v12  ;;  %v225_v16 = vadd.f32 %v439_v13, %v121_v9  ;;  %v440_v17 = vpop.f32.mrb[2].mxu0  ;;  %v151_v14 = vpop.permute.xlu0 %150 }
  0xfc   :  { %v441_v19 = vpop.f32.mrb[3].mxu0 }
  0xfd   :  { %v496_v20 = vpop.f32.mrb[2].mxu1  ;;  %v330_v21 = vadd.f32 %v495_v15, %v225_v16  ;;  %v442_v22 = vadd.f32 %v441_v19, %v440_v17 }
  0xfe   :  { %v497_v23 = vpop.f32.mrb[3].mxu1 }
  0xff   :  { %v498_v24 = vadd.f32 %v497_v23, %v496_v20  ;;  %vm368_vm1 = vcmp.ge.f32.partialorder %v330_v21, 0.0  ;;  %v376_v25 = vmul.f32 0.2, %v330_v21  ;;  %v230_v27 = vadd.f32 %v442_v22, %v126_v18  ;;  %v443_v28 = vpop.f32.mrb[4].mxu0 }
 0x100   :  { %v444_v29 = vpop.f32.mrb[5].mxu0 }
 0x101   :  { %v499_v30 = vpop.f32.mrb[4].mxu1  ;;  %v384_v31 = vsel %vm368_vm1, %v330_v21, %v376_v25  ;;  %v335_v32 = vadd.f32 %v498_v24, %v230_v27  ;;  %v445_v33 = vadd.f32 %v444_v29, %v443_v28  ;;  %v156_v25 = vpop.permute.xlu1 %155 }
 0x102   :  { %v500_v34 = vpop.f32.mrb[5].mxu1  ;;  %393 = vst.msk [vmem:[%s952_s3] sm:$0xff] %vm392_vm0, %v384_v31 }
 0x103   :  { %v501_v35 = vadd.f32 %v500_v34, %v499_v30  ;;  %vm369_vm2 = vcmp.ge.f32.partialorder %v335_v32, 0.0  ;;  %v377_v36 = vmul.f32 0.2, %v335_v32  ;;  %v235_v37 = vadd.f32 %v445_v33, %v131_v26  ;;  %v446_v38 = vpop.f32.mrb[6].mxu0 }
 0x104   :  { %v447_v39 = vpop.f32.mrb[7].mxu0 }
 0x105   :  { %v502_v40 = vpop.f32.mrb[6].mxu1  ;;  %v385_v41 = vsel %vm369_vm2, %v335_v32, %v377_v36  ;;  %v340_v42 = vadd.f32 %v501_v35, %v235_v37  ;;  %v448_v43 = vadd.f32 %v447_v39, %v446_v38 }
 0x106   :  { %v503_v44 = vpop.f32.mrb[7].mxu1  ;;  %394 = vst.msk [vmem:[%s952_s3 + $0x8] sm:$0xff] %vm392_vm0, %v385_v41 }
 0x107   :  { %v504_v46 = vadd.f32 %v503_v44, %v502_v40  ;;  %vm370_vm3 = vcmp.ge.f32.partialorder %v340_v42, 0.0  ;;  %v378_v47 = vmul.f32 0.2, %v340_v42  ;;  %v240_v48 = vadd.f32 %v448_v43, %v136_v45  ;;  %v449_v49 = vpop.f32.mrb[8].mxu0 }
 0x108   :  { %v450_v50 = vpop.f32.mrb[9].mxu0 }
 0x109   :  { %v505_v51 = vpop.f32.mrb[8].mxu1  ;;  %v386_v52 = vsel %vm370_vm3, %v340_v42, %v378_v47  ;;  %v345_v53 = vadd.f32 %v504_v46, %v240_v48  ;;  %v451_v54 = vadd.f32 %v450_v50, %v449_v49 }
 0x10a   :  { %v506_v55 = vpop.f32.mrb[9].mxu1  ;;  %395 = vst.msk [vmem:[%s952_s3 + $0x10] sm:$0xff] %vm392_vm0, %v386_v52 }
 0x10b   :  { %v507_v57 = vadd.f32 %v506_v55, %v505_v51  ;;  %vm371_vm4 = vcmp.ge.f32.partialorder %v345_v53, 0.0  ;;  %v379_v58 = vmul.f32 0.2, %v345_v53  ;;  %v245_v59 = vadd.f32 %v451_v54, %v141_v56  ;;  %v452_v60 = vpop.f32.mrb[10].mxu0 }
 0x10c   :  { %v453_v61 = vpop.f32.mrb[11].mxu0 }
 0x10d   :  { %v508_v62 = vpop.f32.mrb[10].mxu1  ;;  %v387_v63 = vsel %vm371_vm4, %v345_v53, %v379_v58  ;;  %v350_v0 = vadd.f32 %v507_v57, %v245_v59  ;;  %v454_v1 = vadd.f32 %v453_v61, %v452_v60 }
 0x10e   :  { %v509_v2 = vpop.f32.mrb[11].mxu1  ;;  %396 = vst.msk [vmem:[%s952_s3 + $0x18] sm:$0xff] %vm392_vm0, %v387_v63 }
 0x10f   :  { %v510_v4 = vadd.f32 %v509_v2, %v508_v62  ;;  %vm372_vm5 = vcmp.ge.f32.partialorder %v350_v0, 0.0  ;;  %v380_v5 = vmul.f32 0.2, %v350_v0  ;;  %v250_v6 = vadd.f32 %v454_v1, %v146_v3  ;;  %v455_v7 = vpop.f32.mrb[12].mxu0 }
 0x110   :  { %v456_v8 = vpop.f32.mrb[13].mxu0 }
 0x111   :  { %v511_v9 = vpop.f32.mrb[12].mxu1  ;;  %v388_v10 = vsel %vm372_vm5, %v350_v0, %v380_v5  ;;  %v355_v11 = vadd.f32 %v510_v4, %v250_v6  ;;  %v457_v12 = vadd.f32 %v456_v8, %v455_v7 }
 0x112   :  { %v512_v13 = vpop.f32.mrb[13].mxu1  ;;  %397 = vst.msk [vmem:[%s952_s3 + $0x20] sm:$0xff] %vm392_vm0, %v388_v10 }
 0x113   :  { %v513_v15 = vadd.f32 %v512_v13, %v511_v9  ;;  %vm373_vm6 = vcmp.ge.f32.partialorder %v355_v11, 0.0  ;;  %v381_v16 = vmul.f32 0.2, %v355_v11  ;;  %v255_v17 = vadd.f32 %v457_v12, %v151_v14  ;;  %v458_v18 = vpop.f32.mrb[14].mxu0 }
 0x114   :  { %v459_v19 = vpop.f32.mrb[15].mxu0 }
 0x115   :  { %v514_v20 = vpop.f32.mrb[14].mxu1  ;;  %v389_v21 = vsel %vm373_vm6, %v355_v11, %v381_v16  ;;  %v360_v22 = vadd.f32 %v513_v15, %v255_v17  ;;  %v460_v23 = vadd.f32 %v459_v19, %v458_v18 }
 0x116   :  { %v515_v24 = vpop.f32.mrb[15].mxu1  ;;  %398 = vst.msk [vmem:[%s952_s3 + $0x28] sm:$0xff] %vm392_vm0, %v389_v21 }
 0x117   :  { %v516_v26 = vadd.f32 %v515_v24, %v514_v20  ;;  %vm374_vm7 = vcmp.ge.f32.partialorder %v360_v22, 0.0  ;;  %v382_v27 = vmul.f32 0.2, %v360_v22  ;;  %v260_v28 = vadd.f32 %v460_v23, %v156_v25 }
 0x119   :  { %v390_v29 = vsel %vm374_vm7, %v360_v22, %v382_v27  ;;  %v365_v30 = vadd.f32 %v516_v26, %v260_v28 }
 0x11a   :  { %399 = vst.msk [vmem:[%s952_s3 + $0x30] sm:$0xff] %vm392_vm0, %v390_v29 }
 0x11b   :  { %vm375_vm8 = vcmp.ge.f32.partialorder %v365_v30, 0.0  ;;  %v383_v31 = vmul.f32 0.2, %v365_v30 }
 0x11d   :  { %v391_v32 = vsel %vm375_vm8, %v365_v30, %v383_v31 }
 0x11e   :  { %400 = vst.msk [vmem:[%s952_s3 + $0x38] sm:$0xff] %vm392_vm0, %v391_v32 }

// kernel: squeeze.1
= control target key start
LH: loop header
LB: loop body
LE: loop exit
PB: predicated region body
PF: predicated region fallthrough
CT: control target
= control target key end

     0   :  { %vm7_vm0 = vcmask 72704   ;;  %s39_s0 = inlined_call_operand.vmem [shape: f32[18], index: 0, kind: input, shape index: {}]   ;;  %s40_s1 = inlined_call_operand.vmem [shape: f32[2,9], index: 1, kind: output, shape index: {}]  }
   0x1   :  { %v4_v0 = vld [vmem:[%s39_s0] sm:$0x1]  ;;  %s22_s0 = smov 119  }
   0x2   :  { %5 = vst [vmem:[#allocation1] sm:$0x1] %v4_v0 }
   0x9   :  { %v9_v1 = vld [vmem:[#allocation1] sm:$0x1]  }
   0xa   :  { %v6_v2 = vld [vmem:[#allocation1] sm:$0x1]   ;;  %10 = vrot.lane.b32.xlu0 %v9_v1, %s22_s0 }
   0xb   :  { %8 = vst.msk [vmem:[#allocation0] sm:$0x1] %vm7_vm0, %v6_v2  }
  0x7c   :  { %v11_v3 = vpop.permute.xlu0 %10  }
  0x7d   :  { %14 = vst.msk [vmem:[#allocation0 + $0x1] sm:$0x1] %vm7_vm0, %v11_v3  }
  0x84   :  { %v18_v4 = vld [vmem:[#allocation0] sm:$0x3] }
  0x85   :  { %20 = vst [vmem:[%s40_s1] sm:$0x3] %v18_v4 }

// kernel: critic_forward.11
= control target key start
LH: loop header
LB: loop body
LE: loop exit
PB: predicated region body
PF: predicated region fallthrough
CT: control target
= control target key end

     0   :  { %v902_v3 = vmov 0   ;;  %vm572_vm0 = vcmask 146432   ;;  %vm577_vm1 = vcmask 139264   ;;  %s1461_s1 = inlined_call_operand.vmem [shape: f32[1024,18], index: 1, kind: input, shape index: {}]   ;;  %s1462_s0 = inlined_call_operand.vmem [shape: f32[33,1024], index: 0, kind: input, shape index: {}]   ;;  %s1463_s2 = inlined_call_operand.vmem [shape: f32[33,1], index: 2, kind: input, shape index: {}]   ;;  %s1464_s3 = inlined_call_operand.vmem [shape: f32[33,18], index: 3, kind: output, shape index: {}]  }
   0x1   :  { %v70_v0 = vld [vmem:[%s1461_s1 + $0x80] sm:$0xff]  ;;  %v71_v1 = vld [vmem:[%s1461_s1 + $0x88] sm:$0xff]  ;;  %900 = vset.pattern.permute.xlu0 %v902_v3  ;;  %901 = vset.pattern.permute.xlu1 %v902_v3  ;;  %v72_v12 = vld [vmem:[%s1461_s1 + $0x90] sm:$0xff] }
   0x2   :  { %v54_v2 = vld [vmem:[%s1461_s1] sm:$0xff]  ;;  %v771_v4 = vpack.c.bf16 %v71_v1, %v70_v0  ;;  %v55_v5 = vld [vmem:[%s1461_s1 + $0x8] sm:$0xff]  ;;  %v73_v14 = vld [vmem:[%s1461_s1 + $0x98] sm:$0xff] }
   0x3   :  { %v102_v6 = vld [vmem:[%s1461_s1 + $0x180] sm:$0xff]  ;;  %v103_v7 = vld [vmem:[%s1461_s1 + $0x188] sm:$0xff]  ;;  %v773_v8 = vpack.c.bf16 %v55_v5, %v54_v2  ;;  %v56_v15 = vld [vmem:[%s1461_s1 + $0x10] sm:$0xff]  ;;  %v775_v17 = vpack.c.bf16 %v73_v14, %v72_v12 }
   0x4   :  { %v803_v9 = vpack.c.bf16 %v103_v7, %v102_v6  ;;  %v86_v10 = vld [vmem:[%s1461_s1 + $0x100] sm:$0xff]  ;;  %v87_v11 = vld [vmem:[%s1461_s1 + $0x108] sm:$0xff]  ;;  %772 = vmatprep.subr.bf16.mxu0 %v771_v4  ;;  %v57_v16 = vld [vmem:[%s1461_s1 + $0x18] sm:$0xff] }
   0x5   :  { %v805_v13 = vpack.c.bf16 %v87_v11, %v86_v10  ;;  %774 = vmatpush3.bf16.msra.mxu0 %v773_v8  ;;  %v777_v18 = vpack.c.bf16 %v57_v16, %v56_v15  ;;  %v104_v19 = vld [vmem:[%s1461_s1 + $0x190] sm:$0xff]  ;;  %v105_v20 = vld [vmem:[%s1461_s1 + $0x198] sm:$0xff]  ;;  %v74_v24 = vld [vmem:[%s1461_s1 + $0xa0] sm:$0xff] }
   0x6   :  { %804 = vmatprep.subr.bf16.mxu1 %v803_v9  ;;  %v88_v21 = vld [vmem:[%s1461_s1 + $0x110] sm:$0xff]  ;;  %v807_v22 = vpack.c.bf16 %v105_v20, %v104_v19  ;;  %v89_v23 = vld [vmem:[%s1461_s1 + $0x118] sm:$0xff]  ;;  %v75_v25 = vld [vmem:[%s1461_s1 + $0xa8] sm:$0xff]  ;;  %776 = vmatprep.subr.bf16.mxu0 %v775_v17 }
   0x7   :  { %806 = vmatpush3.bf16.msra.mxu1 %v805_v13  ;;  %v809_v26 = vpack.c.bf16 %v89_v23, %v88_v21  ;;  %v779_v27 = vpack.c.bf16 %v75_v25, %v74_v24  ;;  %v58_v28 = vld [vmem:[%s1461_s1 + $0x20] sm:$0xff]  ;;  %v59_v29 = vld [vmem:[%s1461_s1 + $0x28] sm:$0xff]  ;;  %v76_v36 = vld [vmem:[%s1461_s1 + $0xb0] sm:$0xff] }
   0x8   :  { %v106_v30 = vld [vmem:[%s1461_s1 + $0x1a0] sm:$0xff]  ;;  %808 = vmatprep.subr.bf16.mxu1 %v807_v22  ;;  %v107_v31 = vld [vmem:[%s1461_s1 + $0x1a8] sm:$0xff]  ;;  %v781_v34 = vpack.c.bf16 %v59_v29, %v58_v28  ;;  %v77_v37 = vld [vmem:[%s1461_s1 + $0xb8] sm:$0xff] }
   0x9   :  { %v90_v32 = vld [vmem:[%s1461_s1 + $0x120] sm:$0xff]  ;;  %v91_v33 = vld [vmem:[%s1461_s1 + $0x128] sm:$0xff]  ;;  %778 = vmatpush3.bf16.msra.mxu0 %v777_v18  ;;  %v811_v35 = vpack.c.bf16 %v107_v31, %v106_v30  ;;  %v60_v38 = vld [vmem:[%s1461_s1 + $0x30] sm:$0xff]  ;;  %v783_v40 = vpack.c.bf16 %v77_v37, %v76_v36 }
   0xa   :  { %780 = vmatprep.subr.bf16.mxu0 %v779_v27  ;;  %v813_v39 = vpack.c.bf16 %v91_v33, %v90_v32  ;;  %v61_v41 = vld [vmem:[%s1461_s1 + $0x38] sm:$0xff]  ;;  %v108_v42 = vld [vmem:[%s1461_s1 + $0x1b0] sm:$0xff]  ;;  %v78_v47 = vld [vmem:[%s1461_s1 + $0xc0] sm:$0xff] }
   0xb   :  { %810 = vmatpush3.bf16.msra.mxu1 %v809_v26  ;;  %v109_v43 = vld [vmem:[%s1461_s1 + $0x1b8] sm:$0xff]  ;;  %v92_v45 = vld [vmem:[%s1461_s1 + $0x130] sm:$0xff]  ;;  %v79_v48 = vld [vmem:[%s1461_s1 + $0xc8] sm:$0xff]  ;;  %v785_v49 = vpack.c.bf16 %v61_v41, %v60_v38 }
   0xc   :  { %812 = vmatprep.subr.bf16.mxu1 %v811_v35  ;;  %v815_v44 = vpack.c.bf16 %v109_v43, %v108_v42  ;;  %v93_v46 = vld [vmem:[%s1461_s1 + $0x138] sm:$0xff]  ;;  %v110_v50 = vld [vmem:[%s1461_s1 + $0x1c0] sm:$0xff]  ;;  %v111_v51 = vld [vmem:[%s1461_s1 + $0x1c8] sm:$0xff]  ;;  %v787_v53 = vpack.c.bf16 %v79_v48, %v78_v47 }
   0xd   :  { %782 = vmatpush3.bf16.msra.mxu0 %v781_v34  ;;  %v817_v52 = vpack.c.bf16 %v93_v46, %v92_v45  ;;  %v62_v54 = vld [vmem:[%s1461_s1 + $0x40] sm:$0xff]  ;;  %v63_v55 = vld [vmem:[%s1461_s1 + $0x48] sm:$0xff]  ;;  %v819_v57 = vpack.c.bf16 %v111_v51, %v110_v50  ;;  %v80_v59 = vld [vmem:[%s1461_s1 + $0xd0] sm:$0xff] }
   0xe   :  { %784 = vmatprep.subr.bf16.mxu0 %v783_v40  ;;  %v94_v56 = vld [vmem:[%s1461_s1 + $0x140] sm:$0xff]  ;;  %v95_v58 = vld [vmem:[%s1461_s1 + $0x148] sm:$0xff]  ;;  %v81_v60 = vld [vmem:[%s1461_s1 + $0xd8] sm:$0xff]  ;;  %v789_v63 = vpack.c.bf16 %v63_v55, %v62_v54 }
   0xf   :  { %814 = vmatpush3.bf16.msra.mxu1 %v813_v39  ;;  %v112_v61 = vld [vmem:[%s1461_s1 + $0x1d0] sm:$0xff]  ;;  %v113_v62 = vld [vmem:[%s1461_s1 + $0x1d8] sm:$0xff]  ;;  %v821_v0 = vpack.c.bf16 %v95_v58, %v94_v56  ;;  %v791_v1 = vpack.c.bf16 %v81_v60, %v80_v59  ;;  %v82_v7 = vld [vmem:[%s1461_s1 + $0xe0] sm:$0xff] }
  0x10   :  { %816 = vmatprep.subr.bf16.mxu1 %v815_v44  ;;  %v64_v2 = vld [vmem:[%s1461_s1 + $0x50] sm:$0xff]  ;;  %v65_v3 = vld [vmem:[%s1461_s1 + $0x58] sm:$0xff]  ;;  %v823_v5 = vpack.c.bf16 %v113_v62, %v112_v61  ;;  %v83_v8 = vld [vmem:[%s1461_s1 + $0xe8] sm:$0xff] }
  0x11   :  { %786 = vmatpush3.bf16.msra.mxu0 %v785_v49  ;;  %v96_v4 = vld [vmem:[%s1461_s1 + $0x150] sm:$0xff]  ;;  %v97_v6 = vld [vmem:[%s1461_s1 + $0x158] sm:$0xff]  ;;  %v114_v9 = vld [vmem:[%s1461_s1 + $0x1e0] sm:$0xff]  ;;  %v793_v11 = vpack.c.bf16 %v65_v3, %v64_v2  ;;  %v795_v15 = vpack.c.bf16 %v83_v8, %v82_v7 }
  0x12   :  { %788 = vmatprep.subr.bf16.mxu0 %v787_v53  ;;  %v115_v10 = vld [vmem:[%s1461_s1 + $0x1e8] sm:$0xff]  ;;  %v66_v12 = vld [vmem:[%s1461_s1 + $0x60] sm:$0xff]  ;;  %v825_v14 = vpack.c.bf16 %v97_v6, %v96_v4  ;;  %v84_v20 = vld [vmem:[%s1461_s1 + $0xf0] sm:$0xff] }
  0x13   :  { %818 = vmatpush3.bf16.msra.mxu1 %v817_v52  ;;  %v67_v13 = vld [vmem:[%s1461_s1 + $0x68] sm:$0xff]  ;;  %v98_v16 = vld [vmem:[%s1461_s1 + $0x160] sm:$0xff]  ;;  %v827_v19 = vpack.c.bf16 %v115_v10, %v114_v9  ;;  %v85_v21 = vld [vmem:[%s1461_s1 + $0xf8] sm:$0xff] }
  0x14   :  { %820 = vmatprep.subr.bf16.mxu1 %v819_v57  ;;  %v99_v17 = vld [vmem:[%s1461_s1 + $0x168] sm:$0xff]  ;;  %v17_v22 = vld [vmem:[%s1462_s0 + $0x18] sm:$0xff]  ;;  %v116_v23 = vld [vmem:[%s1461_s1 + $0x1f0] sm:$0xff]  ;;  %v797_v25 = vpack.c.bf16 %v67_v13, %v66_v12  ;;  %v799_v27 = vpack.c.bf16 %v85_v21, %v84_v20 }
  0x15   :  { %790 = vmatpush3.bf16.msra.mxu0 %v789_v63  ;;  %v15_v18 = vld [vmem:[%s1462_s0 + $0x8] sm:$0xff]  ;;  %v117_v24 = vld [vmem:[%s1461_s1 + $0x1f8] sm:$0xff]  ;;  %366 = vmatprep.mubr.f32.mxu1 %v17_v22  ;;  %v829_v26 = vpack.c.bf16 %v99_v17, %v98_v16  ;;  %v68_v28 = vld [vmem:[%s1461_s1 + $0x70] sm:$0xff] }
  0x16   :  { %792 = vmatprep.subr.bf16.mxu0 %v791_v1  ;;  %276 = vmatprep.mubr.f32.mxu0 %v15_v18  ;;  %v69_v29 = vld [vmem:[%s1461_s1 + $0x78] sm:$0xff]  ;;  %v100_v30 = vld [vmem:[%s1461_s1 + $0x170] sm:$0xff]  ;;  %v831_v31 = vpack.c.bf16 %v117_v24, %v116_v23  ;;  %v134_v33 = vld [vmem:[%s1461_s1 + $0x280] sm:$0xff] }
  0x17   :  { %822 = vmatpush3.bf16.msra.mxu1 %v821_v0  ;;  %v101_v32 = vld [vmem:[%s1461_s1 + $0x178] sm:$0xff]  ;;  %v135_v34 = vld [vmem:[%s1461_s1 + $0x288] sm:$0xff]  ;;  %v166_v35 = vld [vmem:[%s1461_s1 + $0x380] sm:$0xff]  ;;  %v801_v37 = vpack.c.bf16 %v69_v29, %v68_v28 }
  0x18   :  { %824 = vmatprep.subr.bf16.mxu1 %v823_v5  ;;  %v167_v36 = vld [vmem:[%s1461_s1 + $0x388] sm:$0xff]  ;;  %v833_v38 = vpack.c.bf16 %v101_v32, %v100_v30  ;;  %v835_v39 = vpack.c.bf16 %v135_v34, %v134_v33  ;;  %v118_v40 = vld [vmem:[%s1461_s1 + $0x200] sm:$0xff]  ;;  %v136_v45 = vld [vmem:[%s1461_s1 + $0x290] sm:$0xff] }
  0x19   :  { %794 = vmatpush3.bf16.msra.mxu0 %v793_v11  ;;  %v119_v41 = vld [vmem:[%s1461_s1 + $0x208] sm:$0xff]  ;;  %v150_v42 = vld [vmem:[%s1461_s1 + $0x300] sm:$0xff]  ;;  %v867_v43 = vpack.c.bf16 %v167_v36, %v166_v35  ;;  %v137_v46 = vld [vmem:[%s1461_s1 + $0x298] sm:$0xff] }
  0x1a   :  { %796 = vmatprep.subr.bf16.mxu0 %v795_v15  ;;  %v151_v44 = vld [vmem:[%s1461_s1 + $0x308] sm:$0xff]  ;;  %v168_v47 = vld [vmem:[%s1461_s1 + $0x390] sm:$0xff]  ;;  %v169_v48 = vld [vmem:[%s1461_s1 + $0x398] sm:$0xff]  ;;  %v837_v50 = vpack.c.bf16 %v119_v41, %v118_v40  ;;  %v839_v53 = vpack.c.bf16 %v137_v46, %v136_v45 }
  0x1b   :  { %826 = vmatpush3.bf16.msra.mxu1 %v825_v14  ;;  %v14_v49 = vld [vmem:[%s1462_s0] sm:$0xff]  ;;  %v16_v51 = vld [vmem:[%s1462_s0 + $0x10] sm:$0xff]  ;;  %v869_v52 = vpack.c.bf16 %v151_v44, %v150_v42  ;;  %v121_v55 = vld [vmem:[%s1461_s1 + $0x218] sm:$0xff]  ;;  %v871_v57 = vpack.c.bf16 %v169_v48, %v168_v47 }
  0x1c   :  { %828 = vmatprep.subr.bf16.mxu1 %v827_v19  ;;  %v120_v54 = vld [vmem:[%s1461_s1 + $0x210] sm:$0xff]  ;;  %v153_v58 = vld [vmem:[%s1461_s1 + $0x318] sm:$0xff]  ;;  %v138_v59 = vld [vmem:[%s1461_s1 + $0x2a0] sm:$0xff] }
  0x1d   :  { %798 = vmatpush3.bf16.msra.mxu0 %v797_v25  ;;  %v152_v56 = vld [vmem:[%s1461_s1 + $0x310] sm:$0xff]  ;;  %v139_v60 = vld [vmem:[%s1461_s1 + $0x2a8] sm:$0xff]  ;;  %v170_v61 = vld [vmem:[%s1461_s1 + $0x3a0] sm:$0xff]  ;;  %v841_v0 = vpack.c.bf16 %v121_v55, %v120_v54 }
  0x1e   :  { %800 = vmatprep.subr.bf16.mxu0 %v799_v27  ;;  %v171_v62 = vld [vmem:[%s1461_s1 + $0x3a8] sm:$0xff]  ;;  %v122_v1 = vld [vmem:[%s1461_s1 + $0x220] sm:$0xff]  ;;  %v25_v3 = vld [vmem:[%s1462_s0 + $0x58] sm:$0xff]  ;;  %v873_v4 = vpack.c.bf16 %v153_v58, %v152_v56  ;;  %v843_v5 = vpack.c.bf16 %v139_v60, %v138_v59 }
  0x1f   :  { %830 = vmatpush3.bf16.msra.mxu1 %v829_v26  ;;  %v23_v63 = vld [vmem:[%s1462_s0 + $0x48] sm:$0xff]  ;;  %v22_v2 = vld [vmem:[%s1462_s0 + $0x40] sm:$0xff]  ;;  %v24_v8 = vld [vmem:[%s1462_s0 + $0x50] sm:$0xff]  ;;  %v875_v9 = vpack.c.bf16 %v171_v62, %v170_v61 }
  0x20   :  { %832 = vmatprep.subr.bf16.mxu1 %v831_v31  ;;  %v123_v6 = vld [vmem:[%s1461_s1 + $0x228] sm:$0xff]  ;;  %v154_v7 = vld [vmem:[%s1461_s1 + $0x320] sm:$0xff]  ;;  %v140_v11 = vld [vmem:[%s1461_s1 + $0x2b0] sm:$0xff] }
  0x21   :  { %802 = vmatpush3.bf16.msra.mxu0 %v801_v37  ;;  %v155_v10 = vld [vmem:[%s1461_s1 + $0x328] sm:$0xff]  ;;  %v141_v12 = vld [vmem:[%s1461_s1 + $0x2b8] sm:$0xff]  ;;  %v172_v13 = vld [vmem:[%s1461_s1 + $0x3b0] sm:$0xff]  ;;  %v845_v16 = vpack.c.bf16 %v123_v6, %v122_v1 }
  0x22   :  { %836 = vmatprep.subr.bf16.mxu0 %v835_v39  ;;  %v173_v14 = vld [vmem:[%s1461_s1 + $0x3b8] sm:$0xff]  ;;  %v31_v15 = vld [vmem:[%s1462_s0 + $0x88] sm:$0xff]  ;;  %v124_v17 = vld [vmem:[%s1461_s1 + $0x230] sm:$0xff]  ;;  %v877_v20 = vpack.c.bf16 %v155_v10, %v154_v7  ;;  %v847_v21 = vpack.c.bf16 %v141_v12, %v140_v11 }
  0x23   :  { %834 = vmatpush3.bf16.msra.mxu1 %v833_v38  ;;  %v30_v18 = vld [vmem:[%s1462_s0 + $0x80] sm:$0xff]  ;;  %v33_v19 = vld [vmem:[%s1462_s0 + $0x98] sm:$0xff]  ;;  %v156_v23 = vld [vmem:[%s1461_s1 + $0x330] sm:$0xff]  ;;  %v879_v25 = vpack.c.bf16 %v173_v14, %v172_v13 }
  0x24   :  { %868 = vmatprep.subr.bf16.mxu1 %v867_v43  ;;  %277 = vmatmul.mubr.f32.vlgmr.msra.gmra.mrb[0].mxu0 %v14_v49  ;;  %v125_v22 = vld [vmem:[%s1461_s1 + $0x238] sm:$0xff]  ;;  %v32_v24 = vld [vmem:[%s1462_s0 + $0x90] sm:$0xff]  ;;  %v142_v27 = vld [vmem:[%s1461_s1 + $0x2c0] sm:$0xff] }
  0x25   :  { %838 = vmatpush3.bf16.msra.mxu0 %v837_v50  ;;  %281 = vmatprep.mubr.f32.mxu0 %v23_v63  ;;  %v157_v26 = vld [vmem:[%s1461_s1 + $0x338] sm:$0xff]  ;;  %v143_v28 = vld [vmem:[%s1461_s1 + $0x2c8] sm:$0xff]  ;;  %v174_v29 = vld [vmem:[%s1461_s1 + $0x3c0] sm:$0xff]  ;;  %v849_v32 = vpack.c.bf16 %v125_v22, %v124_v17 }
  0x26   :  { %367 = vmatmul.mubr.f32.vlgmr.msra.gmra.mrb[0].mxu1 %v16_v51  ;;  %840 = vmatprep.subr.bf16.mxu0 %v839_v53  ;;  %v175_v30 = vld [vmem:[%s1461_s1 + $0x3c8] sm:$0xff]  ;;  %v126_v33 = vld [vmem:[%s1461_s1 + $0x240] sm:$0xff]  ;;  %v41_v35 = vld [vmem:[%s1462_s0 + $0xd8] sm:$0xff]  ;;  %v881_v36 = vpack.c.bf16 %v157_v26, %v156_v23  ;;  %v851_v37 = vpack.c.bf16 %v143_v28, %v142_v27 }
  0x27   :  { %870 = vmatpush3.bf16.msra.mxu1 %v869_v52  ;;  %371 = vmatprep.mubr.f32.mxu1 %v25_v3  ;;  %v39_v31 = vld [vmem:[%s1462_s0 + $0xc8] sm:$0xff]  ;;  %v38_v34 = vld [vmem:[%s1462_s0 + $0xc0] sm:$0xff]  ;;  %v40_v40 = vld [vmem:[%s1462_s0 + $0xd0] sm:$0xff]  ;;  %v883_v41 = vpack.c.bf16 %v175_v30, %v174_v29 }
  0x28   :  { %872 = vmatprep.subr.bf16.mxu1 %v871_v57  ;;  %282 = vmatmul.mubr.f32.gmra.mrb[2].mxu0 %v22_v2  ;;  %v127_v38 = vld [vmem:[%s1461_s1 + $0x248] sm:$0xff]  ;;  %v158_v39 = vld [vmem:[%s1461_s1 + $0x340] sm:$0xff]  ;;  %v144_v43 = vld [vmem:[%s1461_s1 + $0x2d0] sm:$0xff] }
  0x29   :  { %842 = vmatpush3.bf16.msra.mxu0 %v841_v0  ;;  %286 = vmatprep.mubr.f32.mxu0 %v31_v15  ;;  %v159_v42 = vld [vmem:[%s1461_s1 + $0x348] sm:$0xff]  ;;  %v145_v44 = vld [vmem:[%s1461_s1 + $0x2d8] sm:$0xff]  ;;  %v176_v45 = vld [vmem:[%s1461_s1 + $0x3d0] sm:$0xff]  ;;  %v853_v48 = vpack.c.bf16 %v127_v38, %v126_v33 }
  0x2a   :  { %372 = vmatmul.mubr.f32.gmra.mrb[2].mxu1 %v24_v8  ;;  %844 = vmatprep.subr.bf16.mxu0 %v843_v5  ;;  %v177_v46 = vld [vmem:[%s1461_s1 + $0x3d8] sm:$0xff]  ;;  %v47_v47 = vld [vmem:[%s1462_s0 + $0x108] sm:$0x1]  ;;  %v128_v49 = vld [vmem:[%s1461_s1 + $0x250] sm:$0xff]  ;;  %v885_v52 = vpack.c.bf16 %v159_v42, %v158_v39  ;;  %v855_v53 = vpack.c.bf16 %v145_v44, %v144_v43 }
  0x2b   :  { %874 = vmatpush3.bf16.msra.mxu1 %v873_v4  ;;  %376 = vmatprep.mubr.f32.mxu1 %v33_v19  ;;  %v46_v50 = vld [vmem:[%s1462_s0 + $0x100] sm:$0x1]  ;;  %v49_v51 = vld [vmem:[%s1462_s0 + $0x118] sm:$0x1]  ;;  %v160_v55 = vld [vmem:[%s1461_s1 + $0x350] sm:$0xff]  ;;  %v887_v57 = vpack.c.bf16 %v177_v46, %v176_v45 }
  0x2c   :  { %876 = vmatprep.subr.bf16.mxu1 %v875_v9  ;;  %287 = vmatmul.mubr.f32.gmra.mrb[4].mxu0 %v30_v18  ;;  %v129_v54 = vld [vmem:[%s1461_s1 + $0x258] sm:$0xff]  ;;  %v48_v56 = vld [vmem:[%s1462_s0 + $0x110] sm:$0x1]  ;;  %v146_v59 = vld [vmem:[%s1461_s1 + $0x2e0] sm:$0xff] }
  0x2d   :  { %846 = vmatpush3.bf16.msra.mxu0 %v845_v16  ;;  %291 = vmatprep.mubr.f32.mxu0 %v39_v31  ;;  %v161_v58 = vld [vmem:[%s1461_s1 + $0x358] sm:$0xff]  ;;  %v147_v60 = vld [vmem:[%s1461_s1 + $0x2e8] sm:$0xff]  ;;  %v178_v61 = vld [vmem:[%s1461_s1 + $0x3e0] sm:$0xff]  ;;  %v857_v0 = vpack.c.bf16 %v129_v54, %v128_v49 }
  0x2e   :  { %377 = vmatmul.mubr.f32.gmra.mrb[4].mxu1 %v32_v24  ;;  %848 = vmatprep.subr.bf16.mxu0 %v847_v21  ;;  %v179_v62 = vld [vmem:[%s1461_s1 + $0x3e8] sm:$0xff]  ;;  %v21_v1 = vld [vmem:[%s1462_s0 + $0x38] sm:$0xff]  ;;  %v889_v2 = vpack.c.bf16 %v161_v58, %v160_v55  ;;  %v859_v3 = vpack.c.bf16 %v147_v60, %v146_v59  ;;  %v130_v4 = vld [vmem:[%s1461_s1 + $0x260] sm:$0xff] }
  0x2f   :  { %878 = vmatpush3.bf16.msra.mxu1 %v877_v20  ;;  %381 = vmatprep.mubr.f32.mxu1 %v41_v35  ;;  %v19_v63 = vld [vmem:[%s1462_s0 + $0x28] sm:$0xff]  ;;  %v162_v6 = vld [vmem:[%s1461_s1 + $0x360] sm:$0xff]  ;;  %v891_v7 = vpack.c.bf16 %v179_v62, %v178_v61  ;;  %v148_v9 = vld [vmem:[%s1461_s1 + $0x2f0] sm:$0xff] }
  0x30   :  { %880 = vmatprep.subr.bf16.mxu1 %v879_v25  ;;  %292 = vmatmul.mubr.f32.gmra.mrb[6].mxu0 %v38_v34  ;;  %v131_v5 = vld [vmem:[%s1461_s1 + $0x268] sm:$0xff]  ;;  %v149_v10 = vld [vmem:[%s1461_s1 + $0x2f8] sm:$0xff]  ;;  %v180_v11 = vld [vmem:[%s1461_s1 + $0x3f0] sm:$0xff] }
  0x31   :  { %850 = vmatpush3.bf16.msra.mxu0 %v849_v32  ;;  %296 = vmatprep.mubr.f32.mxu0 %v47_v47  ;;  %v163_v8 = vld [vmem:[%s1461_s1 + $0x368] sm:$0xff]  ;;  %v181_v12 = vld [vmem:[%s1461_s1 + $0x3f8] sm:$0xff]  ;;  %v861_v13 = vpack.c.bf16 %v131_v5, %v130_v4  ;;  %v182_v14 = vld [vmem:[%s1463_s2] sm:$0xff]  ;;  %v863_v17 = vpack.c.bf16 %v149_v10, %v148_v9 }
  0x32   :  { %382 = vmatmul.mubr.f32.gmra.mrb[6].mxu1 %v40_v40  ;;  %852 = vmatprep.subr.bf16.mxu0 %v851_v37  ;;  %v184_v15 = vld [vmem:[%s1463_s2 + $0x10] sm:$0xff]  ;;  %v893_v16 = vpack.c.bf16 %v163_v8, %v162_v6  ;;  %v133_v19 = vld [vmem:[%s1461_s1 + $0x278] sm:$0xff]  ;;  %v895_v20 = vpack.c.bf16 %v181_v12, %v180_v11  ;;  %v183_v23 = vld [vmem:[%s1463_s2 + $0x8] sm:$0xff] }
  0x33   :  { %882 = vmatpush3.bf16.msra.mxu1 %v881_v36  ;;  %386 = vmatprep.mubr.f32.mxu1 %v49_v51  ;;  %v132_v18 = vld [vmem:[%s1461_s1 + $0x270] sm:$0xff]  ;;  %v165_v22 = vld [vmem:[%s1461_s1 + $0x378] sm:$0xff]  ;;  %v186_v27 = vld [vmem:[%s1463_s2 + $0x20] sm:$0x1] }
  0x34   :  { %884 = vmatprep.subr.bf16.mxu1 %v883_v41  ;;  %297 = vmatmul.mubr.f32.gmra.mrb[8].mxu0 %v46_v50  ;;  %v164_v21 = vld [vmem:[%s1461_s1 + $0x370] sm:$0xff]  ;;  %v865_v24 = vpack.c.bf16 %v133_v19, %v132_v18  ;;  %v185_v25 = vld [vmem:[%s1463_s2 + $0x18] sm:$0xff]  ;;  %v18_v28 = vld [vmem:[%s1462_s0 + $0x20] sm:$0xff] }
  0x35   :  { %854 = vmatpush3.bf16.msra.mxu0 %v853_v48  ;;  %456 = vmatprep.mubr.f32.mxu0 %v19_v63  ;;  %v897_v26 = vpack.c.bf16 %v165_v22, %v164_v21  ;;  %v20_v29 = vld [vmem:[%s1462_s0 + $0x30] sm:$0xff]  ;;  %v27_v30 = vld [vmem:[%s1462_s0 + $0x68] sm:$0xff]  ;;  %v29_v31 = vld [vmem:[%s1462_s0 + $0x78] sm:$0xff] }
  0x36   :  { %387 = vmatmul.mubr.f32.gmra.mrb[8].mxu1 %v48_v56  ;;  %856 = vmatprep.subr.bf16.mxu0 %v855_v53  ;;  %v26_v32 = vld [vmem:[%s1462_s0 + $0x60] sm:$0xff]  ;;  %v28_v33 = vld [vmem:[%s1462_s0 + $0x70] sm:$0xff]  ;;  %v35_v34 = vld [vmem:[%s1462_s0 + $0xa8] sm:$0xff] }
  0x37   :  { %886 = vmatpush3.bf16.msra.mxu1 %v885_v52  ;;  %546 = vmatprep.mubr.f32.mxu1 %v21_v1  ;;  %v37_v35 = vld [vmem:[%s1462_s0 + $0xb8] sm:$0xff]  ;;  %v34_v36 = vld [vmem:[%s1462_s0 + $0xa0] sm:$0xff]  ;;  %v36_v37 = vld [vmem:[%s1462_s0 + $0xb0] sm:$0xff] }
  0x38   :  { %888 = vmatprep.subr.bf16.mxu1 %v887_v57  ;;  %189 = vperm.xlu0 %900, %v182_v14   ;;  %v43_v38 = vld [vmem:[%s1462_s0 + $0xe8] sm:$0xff]  ;;  %v45_v39 = vld [vmem:[%s1462_s0 + $0xf8] sm:$0xff]  ;;  %v42_v40 = vld [vmem:[%s1462_s0 + $0xe0] sm:$0xff] }
  0x39   :  { %858 = vmatpush3.bf16.msra.mxu0 %v857_v0  ;;  %199 = vperm.xlu1 %901, %v184_v15   ;;  %v44_v41 = vld [vmem:[%s1462_s0 + $0xf0] sm:$0xff]  ;;  %v51_v42 = vld [vmem:[%s1462_s0 + $0x128] sm:$0x1]  ;;  %v53_v43 = vld [vmem:[%s1462_s0 + $0x138] sm:$0x1] }
  0x3a   :  { %860 = vmatprep.subr.bf16.mxu0 %v859_v3  ;;  %v50_v44 = vld [vmem:[%s1462_s0 + $0x120] sm:$0x1]  ;;  %v52_v45 = vld [vmem:[%s1462_s0 + $0x130] sm:$0x1] }
  0x3b   :  { %890 = vmatpush3.bf16.msra.mxu1 %v889_v2 }
  0x3c   :  { %892 = vmatprep.subr.bf16.mxu1 %v891_v7  ;;  %194 = vperm.xlu0 %900, %v183_v23  }
  0x3d   :  { %862 = vmatpush3.bf16.msra.mxu0 %v861_v13  ;;  %204 = vperm.xlu1 %901, %v185_v25  }
  0x3e   :  { %864 = vmatprep.subr.bf16.mxu0 %v863_v17 }
  0x3f   :  { %894 = vmatpush3.bf16.msra.mxu1 %v893_v16 }
  0x40   :  { %896 = vmatprep.subr.bf16.mxu1 %v895_v20  ;;  %209 = vperm.xlu0 %900, %v186_v27  }
  0x41   :  { %866 = vmatpush3.bf16.msra.mxu0 %v865_v24 }
  0x43   :  { %898 = vmatpush3.bf16.msra.mxu1 %v897_v26 }
  0x44   :  { %457 = vmatmul.mubr.f32.vlgmr.msra.gmra.mrb[10].mxu0 %v18_v28 }
  0x45   :  { %461 = vmatprep.mubr.f32.mxu0 %v27_v30 }
  0x46   :  { %547 = vmatmul.mubr.f32.vlgmr.msra.gmra.mrb[10].mxu1 %v20_v29 }
  0x47   :  { %551 = vmatprep.mubr.f32.mxu1 %v29_v31 }
  0x48   :  { %462 = vmatmul.mubr.f32.gmra.mrb[12].mxu0 %v26_v32 }
  0x49   :  { %466 = vmatprep.mubr.f32.mxu0 %v35_v34 }
  0x4a   :  { %552 = vmatmul.mubr.f32.gmra.mrb[12].mxu1 %v28_v33 }
  0x4b   :  { %556 = vmatprep.mubr.f32.mxu1 %v37_v35 }
  0x4c   :  { %467 = vmatmul.mubr.f32.gmra.mrb[14].mxu0 %v34_v36 }
  0x4d   :  { %471 = vmatprep.mubr.f32.mxu0 %v43_v38 }
  0x4e   :  { %557 = vmatmul.mubr.f32.gmra.mrb[14].mxu1 %v36_v37 }
  0x4f   :  { %561 = vmatprep.mubr.f32.mxu1 %v45_v39 }
  0x50   :  { %472 = vmatmul.mubr.f32.gmra.mrb[16].mxu0 %v42_v40 }
  0x51   :  { %476 = vmatprep.mubr.f32.mxu0 %v51_v42 }
  0x52   :  { %562 = vmatmul.mubr.f32.gmra.mrb[16].mxu1 %v44_v41 }
  0x53   :  { %566 = vmatprep.mubr.f32.mxu1 %v53_v43 }
  0x54   :  { %477 = vmatmul.mubr.f32.gmra.mrb[18].mxu0 %v50_v44 }
  0x56   :  { %567 = vmatmul.mubr.f32.gmra.mrb[18].mxu1 %v52_v45 }
  0xb7   :  { %v190_v47 = vpop.permute.xlu0 %189 }
  0xb8   :  { %v200_v61 = vpop.permute.xlu1 %199 }
  0xbb   :  { %v195_v55 = vpop.permute.xlu0 %194 }
  0xbc   :  { %v205_v9 = vpop.permute.xlu1 %204 }
  0xbf   :  { %v210_v18 = vpop.permute.xlu0 %209 }
  0xf7   :  { %v615_v46 = vpop.f32.mrb[0].mxu0 }
  0xf8   :  { %v616_v48 = vpop.f32.mrb[1].mxu0 }
  0xf9   :  { %v662_v49 = vpop.f32.mrb[0].mxu1  ;;  %v617_v50 = vadd.f32 %v616_v48, %v615_v46 }
  0xfa   :  { %v663_v51 = vpop.f32.mrb[1].mxu1 }
  0xfb   :  { %v664_v52 = vadd.f32 %v663_v51, %v662_v49  ;;  %v279_v53 = vadd.f32 %v617_v50, %v190_v47  ;;  %v618_v54 = vpop.f32.mrb[2].mxu0 }
  0xfc   :  { %v619_v56 = vpop.f32.mrb[3].mxu0 }
  0xfd   :  { %v665_v57 = vpop.f32.mrb[2].mxu1  ;;  %v369_v58 = vadd.f32 %v664_v52, %v279_v53  ;;  %v620_v59 = vadd.f32 %v619_v56, %v618_v54 }
  0xfe   :  { %v666_v60 = vpop.f32.mrb[3].mxu1 }
  0xff   :  { %v667_v62 = vadd.f32 %v666_v60, %v665_v57  ;;  %v284_v63 = vadd.f32 %v620_v59, %v195_v55  ;;  %v621_v0 = vpop.f32.mrb[4].mxu0 }
 0x100   :  { %v622_v1 = vpop.f32.mrb[5].mxu0 }
 0x101   :  { %v668_v2 = vpop.f32.mrb[4].mxu1  ;;  %v374_v3 = vadd.f32 %v667_v62, %v284_v63  ;;  %v623_v4 = vadd.f32 %v622_v1, %v621_v0 }
 0x102   :  { %v669_v5 = vpop.f32.mrb[5].mxu1 }
 0x103   :  { %v670_v6 = vadd.f32 %v669_v5, %v668_v2  ;;  %v289_v7 = vadd.f32 %v623_v4, %v200_v61  ;;  %v624_v8 = vpop.f32.mrb[6].mxu0 }
 0x104   :  { %v625_v10 = vpop.f32.mrb[7].mxu0 }
 0x105   :  { %v671_v11 = vpop.f32.mrb[6].mxu1  ;;  %v379_v12 = vadd.f32 %v670_v6, %v289_v7  ;;  %v626_v13 = vadd.f32 %v625_v10, %v624_v8 }
 0x106   :  { %v672_v14 = vpop.f32.mrb[7].mxu1 }
 0x107   :  { %v673_v15 = vadd.f32 %v672_v14, %v671_v11  ;;  %v294_v16 = vadd.f32 %v626_v13, %v205_v9  ;;  %v627_v17 = vpop.f32.mrb[8].mxu0 }
 0x108   :  { %v628_v19 = vpop.f32.mrb[9].mxu0 }
 0x109   :  { %v674_v20 = vpop.f32.mrb[8].mxu1  ;;  %v384_v21 = vadd.f32 %v673_v15, %v294_v16  ;;  %v629_v22 = vadd.f32 %v628_v19, %v627_v17 }
 0x10a   :  { %v675_v23 = vpop.f32.mrb[9].mxu1 }
 0x10b   :  { %v676_v24 = vadd.f32 %v675_v23, %v674_v20  ;;  %v299_v25 = vadd.f32 %v629_v22, %v210_v18 }
 0x10d   :  { %v389_v26 = vadd.f32 %v676_v24, %v299_v25 }
 0x117   :  { %v709_v27 = vpop.f32.mrb[10].mxu0 }
 0x118   :  { %v710_v28 = vpop.f32.mrb[11].mxu0 }
 0x119   :  { %v756_v29 = vpop.f32.mrb[10].mxu1  ;;  %v711_v30 = vadd.f32 %v710_v28, %v709_v27 }
 0x11a   :  { %v757_v31 = vpop.f32.mrb[11].mxu1 }
 0x11b   :  { %v758_v32 = vadd.f32 %v757_v31, %v756_v29  ;;  %v459_v33 = vadd.f32 %v711_v30, %v369_v58  ;;  %v712_v34 = vpop.f32.mrb[12].mxu0 }
 0x11c   :  { %v713_v35 = vpop.f32.mrb[13].mxu0 }
 0x11d   :  { %v759_v36 = vpop.f32.mrb[12].mxu1  ;;  %v549_v37 = vadd.f32 %v758_v32, %v459_v33  ;;  %v714_v38 = vadd.f32 %v713_v35, %v712_v34 }
 0x11e   :  { %v760_v39 = vpop.f32.mrb[13].mxu1 }
 0x11f   :  { %v761_v40 = vadd.f32 %v760_v39, %v759_v36  ;;  %573 = vst.msk [vmem:[%s1464_s3] sm:$0xff] %vm572_vm0, %v549_v37  ;;  %v464_v41 = vadd.f32 %v714_v38, %v374_v3  ;;  %v715_v42 = vpop.f32.mrb[14].mxu0 }
 0x120   :  { %v716_v43 = vpop.f32.mrb[15].mxu0 }
 0x121   :  { %v762_v44 = vpop.f32.mrb[14].mxu1  ;;  %v554_v45 = vadd.f32 %v761_v40, %v464_v41  ;;  %v717_v46 = vadd.f32 %v716_v43, %v715_v42 }
 0x122   :  { %v763_v47 = vpop.f32.mrb[15].mxu1 }
 0x123   :  { %v764_v48 = vadd.f32 %v763_v47, %v762_v44  ;;  %574 = vst.msk [vmem:[%s1464_s3 + $0x8] sm:$0xff] %vm572_vm0, %v554_v45  ;;  %v469_v49 = vadd.f32 %v717_v46, %v379_v12  ;;  %v718_v50 = vpop.f32.mrb[16].mxu0 }
 0x124   :  { %v719_v51 = vpop.f32.mrb[17].mxu0 }
 0x125   :  { %v765_v52 = vpop.f32.mrb[16].mxu1  ;;  %v559_v53 = vadd.f32 %v764_v48, %v469_v49  ;;  %v720_v54 = vadd.f32 %v719_v51, %v718_v50 }
 0x126   :  { %v766_v55 = vpop.f32.mrb[17].mxu1 }
 0x127   :  { %v767_v56 = vadd.f32 %v766_v55, %v765_v52  ;;  %575 = vst.msk [vmem:[%s1464_s3 + $0x10] sm:$0xff] %vm572_vm0, %v559_v53  ;;  %v474_v57 = vadd.f32 %v720_v54, %v384_v21  ;;  %v721_v58 = vpop.f32.mrb[18].mxu0 }
 0x128   :  { %v722_v59 = vpop.f32.mrb[19].mxu0 }
 0x129   :  { %v768_v60 = vpop.f32.mrb[18].mxu1  ;;  %v564_v61 = vadd.f32 %v767_v56, %v474_v57  ;;  %v723_v62 = vadd.f32 %v722_v59, %v721_v58 }
 0x12a   :  { %v769_v63 = vpop.f32.mrb[19].mxu1 }
 0x12b   :  { %v770_v0 = vadd.f32 %v769_v63, %v768_v60  ;;  %576 = vst.msk [vmem:[%s1464_s3 + $0x18] sm:$0xff] %vm572_vm0, %v564_v61  ;;  %v479_v1 = vadd.f32 %v723_v62, %v389_v26 }
 0x12d   :  { %v569_v2 = vadd.f32 %v770_v0, %v479_v1 }
 0x12f   :  { %578 = vst.msk [vmem:[%s1464_s3 + $0x20] sm:$0x1] %vm577_vm1, %v569_v2 }

// kernel: critic_forward.13
= control target key start
LH: loop header
LB: loop body
LE: loop exit
PB: predicated region body
PF: predicated region fallthrough
CT: control target
= control target key end

     0   :  { %v133_v0 = vmov 0.0|0.0   ;;  %vm134_vm0 = vmmov 0   ;;  %v135_v4 = vmov 0.0   ;;  %v136_v7 = vmov 0   ;;  %s178_s1 = inlined_call_operand.vmem [shape: f32[32,2], index: 1, kind: input, shape index: {}]   ;;  %s179_s2 = inlined_call_operand.vmem [shape: f32[5,1], index: 2, kind: input, shape index: {}]   ;;  %s180_s0 = inlined_call_operand.vmem [shape: f32[5,32], index: 0, kind: input, shape index: {}]   ;;  %s181_s3 = inlined_call_operand.vmem [shape: f32[5,2], index: 3, kind: output, shape index: {}]  }
   0x1   :  { %122 = vmatprep.subr.bf16.mxu0 %v133_v0  ;;  %v15_v1 = vld [vmem:[%s178_s1] sm:$0xff]  ;;  %v16_v2 = vld [vmem:[%s178_s1 + $0x8] sm:$0xff]  ;;  %v17_v3 = vld [vmem:[%s178_s1 + $0x10] sm:$0xff]  ;;  %119 = vmatprep.mubr.msk.f32.mxu0 %vm134_vm0, %v135_v4  ;;  %vm25_vm1 = vcmask 261120   ;;  %vm99_vm2 = vcmask 12288  }
   0x2   :  { %v123_v5 = vpack.c.bf16 %v16_v2, %v15_v1  ;;  %v18_v6 = vld [vmem:[%s178_s1 + $0x18] sm:$0xff]  ;;  %132 = vset.pattern.permute.xlu0 %v136_v7  ;;  %v19_v8 = vld [vmem:[%s179_s2] sm:$0x1f] }
   0x3   :  { %22 = vperm.xlu0 %132, %v19_v8   ;;  %v126_v9 = vpack.c.bf16 %v18_v6, %v17_v3  ;;  %v14_v10 = vld [vmem:[%s180_s0] sm:$0x1f] }
   0x4   :  { %124 = vmatpush3.bf16.msra.mxu0 %v123_v5 }
   0x5   :  { %125 = vmatprep.subr.bf16.mxu0 %v133_v0 }
   0x8   :  { %127 = vmatpush3.bf16.msra.mxu0 %v126_v9 }
   0xb   :  { %120 = vmatmul.mubr.msk.f32.vlgmr.msra.gmra.mrb[0].mxu0 %vm25_vm1, %v14_v10 }
  0x82   :  { %v23_v11 = vpop.permute.xlu0 %22 }
  0xde   :  { %v95_v12 = vpop.f32.mrb[0].mxu0 }
  0xdf   :  { %v96_v13 = vadd.f32 %v95_v12, %v23_v11  ;;  %v121_v14 = vpop.f32.mrb[1].mxu0 }
  0xe1   :  { %100 = vst.msk [vmem:[%s181_s3] sm:$0x1f] %vm99_vm2, %v96_v13 }

// kernel: critic_forward.12
= control target key start
LH: loop header
LB: loop body
LE: loop exit
PB: predicated region body
PF: predicated region fallthrough
CT: control target
= control target key end

     0   :  { %s221_s0 = inlined_call_operand.vmem [shape: f32[1,9], index: 0, kind: input, shape index: {}]   ;;  %s222_s1 = inlined_call_operand.vmem [shape: f32[9,2], index: 1, kind: input, shape index: {}]   ;;  %s223_s2 = inlined_call_operand.<no memory space> [shape: f32[1,1], index: 2, kind: input, shape index: {}]   ;;  %s224_s3 = inlined_call_operand.hbm [shape: f32[1,2], index: 3, kind: output, shape index: {}]  }
   0x1   :  { %v8_v0 = vstv %s223_s2 }
   0x2   :  { %9 = vst [vmem:[#allocation2] sm:$0x1] %v8_v0 }
   0x3   :  { %v18_v1 = vld [vmem:[%s222_s1] sm:$0xff]  ;;  %v19_v2 = vld [vmem:[%s222_s1 + $0x8] sm:$0x1]  ;;  %vm34_vm0 = vcmask 1040384   ;;  %v171_v3 = vmov 0.0|0.0   ;;  %vm172_vm1 = vmmov 1  }
   0x4   :  { %136 = vmatprep.subr.bf16.mxu0 %v171_v3  ;;  %v137_v4 = vpack.c.bf16 %v19_v2, %v18_v1  ;;  %vm138_vm2 = vmpackc.low %vm34_vm0, %vm172_vm1  ;;  %vm173_vm3 = vmmov 0   ;;  %v174_v5 = vmov 0.0  }
   0x5   :  { %133 = vmatprep.mubr.msk.f32.mxu0 %vm173_vm3, %v174_v5 }
   0x9   :  { %v20_v6 = vld [vmem:[#allocation2] sm:$0x1] }
   0xa   :  { %10 = vsyncpa [#allocation4], 0  ;;  %139 = vmatpush3.bf16.msk.msra.mxu0 %vm138_vm2, %v137_v4  ;;  %v17_v7 = vld [vmem:[%s221_s0] sm:$0x1]  ;;  %vm30_vm4 = vcmask 72704   ;;  %v175_v8 = vmov 0   ;;  %v26_v9 = vlaneseq }
   0xb   :  { %146 = vset.pattern.permute.xlu0 %v175_v8  ;;  %s176_s1 = smov [#allocation3]   ;;  %vm108_vm5 = vcmask 8192  }
   0xc   :  { %23 = vperm.xlu0 %146, %v20_v6   ;;  %v27_v10 = vshrl.u32 %v26_v9, 7  ;;  %s116_s19 = sshll.u32 %s176_s1, 4  ;;  %s117_s19 = int_to_ptr.vmem [resolvable:$true] %s116_s19 }
   0xd   :  { %134 = vmatmul.mubr.msk.f32.vlgmr.msra.gmra.mrb[0].mxu0 %vm30_vm4, %v17_v7  ;;  %s147_s20 = scalar_lea.vmem %s117_s19, 16  ;;  %s151_s0 = scalar_lea.vmem %s117_s19, 32 }
   0xe   :  { %v28_v11 = vsub.s32 0, %v27_v10  ;;  %p148_p0 = scmp.ne.s32.totalorder %s117_s19, %s147_s20  ;;  %p152_p1 = scmp.lt.s32.totalorder %s117_s19, %s117_s19 }
   0xf   :  { %p153_p2 = scmp.lt.s32.totalorder %s151_s0, %s147_s20 }
  0x11   :  { %p154_p3 = por %p153_p2, %p152_p1 }
  0x13   :  { %p155_p4 = pnand %p154_p3, %p148_p0 }
  0x8b   :  { %v24_v12 = vpop.permute.xlu0 %23 }
  0x8c   :  { %v29_v13 = vrot.slane %v24_v12, %v28_v11 }
  0xe0   :  { %v104_v14 = vpop.f32.mrb[0].mxu0 }
  0xe1   :  { %v105_v15 = vadd.f32 %v104_v14, %v29_v13  ;;  %v135_v16 = vpop.f32.mrb[1].mxu0 }
  0xe3   :  { %109 = vst.msk [vmem:[#allocation3] sm:$0x1] %vm108_vm5, %v105_v15 }
  0xe4   :  { %158 = shalt.err (!%p155_p4)
}
  0xe5   :  { %s159_s23 = scalar_lea.hbm %s224_s3, 16 }
  0xe6   :  { %p160_p5 = scmp.ne.s32.totalorder %s224_s3, %s159_s23  ;;  %p163_p6 = scmp.lt.u32.totalorder %s159_s23, %s224_s3 }
  0xe8   :  { %p165_p7 = pnand %p163_p6, %p160_p5 }
  0xea   :  { %168 = shalt.err (!%p165_p7)
}
  0xeb   :  { %119 = dma.vmem_to_hbm [thread:$0]  %s117_s19, 16, %s224_s3, [#allocation4]  }
  0xec   :  { %169 = dma.done.wait [#allocation4], 16  }
  0xed   :  { %170 = vsyncadd [#allocation4], 4294967280 }
  0xee   :  { %123 = vsyncpa [#allocation4], 1 }

</bundles_post_ra>
